<compile_context>
chip_gen: v6e
topology: v6e:2x2x1
jax: 0.10.0
libtpu: 0.0.40
codegen_flags: <defaults>
</compile_context>

<pallas_src>
import functools
import math

import jax
import jax.numpy as jnp
from jax import lax
from jax.experimental import pallas as pl
from jax.experimental.pallas import tpu as pltpu

LN_EPS = 1e-5                       # nn.LayerNorm default
MM_DTYPE = jnp.bfloat16             # MXU operand dtype (accumulation stays f32)
_INV_SQRT2 = 1.0 / math.sqrt(2.0)


# ----------------------------- tiling helpers -------------------------------

@functools.lru_cache(maxsize=None)
def _vmem_limit_bytes():
    """Per-generation VMEM budget; conservative 64 MiB fallback (v7x-sized)."""
    cap = None
    try:
        info = pltpu.get_tpu_info()
        cap = int(getattr(info, "vmem_capacity_bytes", 0)) or None
    except Exception:
        cap = None
    if cap is None:
        cap = 64 * 1024 * 1024
    return int(min(cap * 3 // 4, 100 * 1024 * 1024))


def _pick_tile(dim, target, align):
    """Largest tile <= target that divides dim and is a multiple of align.
    Falls back to the full dim (always legal: block == array extent)."""
    if dim <= target:
        return dim
    t = (target // align) * align
    while t >= align:
        if dim % t == 0:
            return t
        t -= align
    return dim


def _tile_candidates(dim, align, cap=None):
    """Descending list of legal tile sizes for `dim` (full dim always legal)."""
    cands = [dim]
    t = (dim // align) * align
    while t >= align:
        if dim % t == 0:
            cands.append(t)
        t -= align
    cands = sorted(set(cands), reverse=True)
    if cap is not None:
        capped = [c for c in cands if c <= cap]
        if capped:
            cands = capped
    return cands


def _plan_linear_tiles(M, K, N, x_bytes, w_bytes, o_bytes, res_bytes, budget):
    """Pick (tm, tn, tk). Prefer tm = M so each weight tile is streamed once."""
    tm_cands = _tile_candidates(M, 8)
    tk_cands = _tile_candidates(K, 128, cap=_pick_tile(K, 1024, 128))
    tn_target = _pick_tile(N, 512, 128)
    if N >= 256 and N // tn_target < 2:
        tn_target = _pick_tile(N, max(128, N // 2), 128)  # >=2 N blocks (v7x 2 TCs)
    tn_cands = _tile_candidates(N, 128, cap=tn_target)

    def usage(tm, tn, tk):
        return (2 * tm * tk * x_bytes          # double-buffered x tile
                + 2 * tk * tn * w_bytes        # double-buffered weight tile
                + 2 * tm * tn * o_bytes        # double-buffered out tile
                + tm * tn * 4                  # f32 accumulator scratch
                + 2 * tn * 4                   # bias
                + 2 * tm * tn * res_bytes)     # residual tile (0 if none)

    for tm in tm_cands:                        # shrink tk/tn before tm
        for tk in tk_cands:
            for tn in tn_cands:
                if usage(tm, tn, tk) <= budget:
                    return tm, tn, tk
    return tm_cands[-1], tn_cands[-1], tk_cands[-1]


def _plan_ln_tiles(M, K, N, x_bytes, o_bytes, budget):
    tm_cands = _tile_candidates(M, 8)
    tn_cands = _tile_candidates(N, 128, cap=_pick_tile(N, 512, 128))

    def usage(tm, tn):
        return (2 * tm * K * x_bytes           # x row block (constant over j)
                + tm * K * 2                   # cached normalized rows (bf16)
                + 2 * K * tn * 2               # bf16 weight tile
                + 2 * tm * tn * o_bytes        # out tile
                + 4 * K * 4 + 2 * tn * 4)      # gamma/beta/bias

    for tm in tm_cands:
        for tn in tn_cands:
            if usage(tm, tn) <= budget:
                return tm, tn
    return tm_cands[-1], tn_cands[-1]


def _gelu_f32(x):
    # exact (erf) GELU, matching torch nn.GELU() default, computed in f32
    return 0.5 * x * (1.0 + lax.erf(x * _INV_SQRT2))


# ----------------------------- Pallas kernels ------------------------------

def _linear_kernel(*refs, gelu, residual):
    # refs: x, w, b, [res], out, acc_scratch   -- grid (M/tm, N/tn, K/tk)
    x_ref, w_ref, b_ref = refs[0], refs[1], refs[2]
    r_ref = refs[3] if residual else None
    o_ref, acc_ref = refs[-2], refs[-1]

    @pl.when(pl.program_id(2) == 0)
    def _():
        acc_ref[...] = jnp.zeros_like(acc_ref)

    acc_ref[...] += jnp.dot(x_ref[...].astype(MM_DTYPE),
                            w_ref[...].astype(MM_DTYPE),
                            preferred_element_type=jnp.float32)

    @pl.when(pl.program_id(2) == pl.num_programs(2) - 1)
    def _():
        acc = acc_ref[...] + b_ref[...].astype(jnp.float32)
        if gelu:
            acc = _gelu_f32(acc)
        if residual:
            acc = acc + r_ref[...].astype(jnp.float32)
        o_ref[...] = acc.astype(o_ref.dtype)


def _ln_linear_kernel(x_ref, g_ref, bb_ref, w_ref, b_ref, o_ref, h_ref, *, gelu):
    # Fused LayerNorm + Linear (+ optional GELU); full K per block.
    # Normalized bf16 rows are cached in h_ref and reused across the N tiles.
    @pl.when(pl.program_id(1) == 0)
    def _():
        x = x_ref[...].astype(jnp.float32)
        mu = jnp.mean(x, axis=-1, keepdims=True)
        var = jnp.mean(jnp.square(x - mu), axis=-1, keepdims=True)
        h = (x - mu) * lax.rsqrt(var + LN_EPS)
        h = h * g_ref[...] + bb_ref[...]
        h_ref[...] = h.astype(h_ref.dtype)

    acc = jnp.dot(h_ref[...], w_ref[...].astype(MM_DTYPE),
                  preferred_element_type=jnp.float32)
    acc = acc + b_ref[...].astype(jnp.float32)
    if gelu:
        acc = _gelu_f32(acc)
    o_ref[...] = acc.astype(o_ref.dtype)


def _layernorm_kernel(x_ref, g_ref, b_ref, o_ref):
    x = x_ref[...].astype(jnp.float32)
    mu = jnp.mean(x, axis=-1, keepdims=True)
    var = jnp.mean(jnp.square(x - mu), axis=-1, keepdims=True)
    y = (x - mu) * lax.rsqrt(var + LN_EPS)
    o_ref[...] = (y * g_ref[...] + b_ref[...]).astype(o_ref.dtype)


def _attn_kernel(q_ref, k_ref, v_ref, o_ref, *, scale):
    # one group of G (batch, head) tiles per grid step
    # scale folded into q: Sq*Dh multiplies instead of Sq*Sk
    q = (q_ref[...].astype(jnp.float32) * scale).astype(MM_DTYPE)   # [G,Sq,Dh]
    k = k_ref[...].astype(MM_DTYPE)                                 # [G,Sk,Dh]
    v = v_ref[...].astype(MM_DTYPE)                                 # [G,Sk,Dh]
    s = jnp.einsum('gqd,gkd->gqk', q, k, preferred_element_type=jnp.float32)
    s = s - jnp.max(s, axis=-1, keepdims=True)       # softmax stays in f32
    p = jnp.exp(s)
    denom = jnp.sum(p, axis=-1, keepdims=True)
    o = jnp.einsum('gqk,gkd->gqd', p.astype(MM_DTYPE), v,
                   preferred_element_type=jnp.float32)
    o_ref[...] = (o * pl.reciprocal(denom, approx=True)).astype(o_ref.dtype)


# ------------------------------- wrappers -----------------------------------

def pallas_linear(x2d, w, b, gelu=False, residual=None, out_dtype=None):
    """(M,N,K)-tiled x @ W + b [+ GELU] [+ residual]; tm defaults to M."""
    M, K = x2d.shape
    N = w.shape[1]
    out_dtype = jnp.dtype(out_dtype if out_dtype is not None else x2d.dtype)
    budget = int(_vmem_limit_bytes() * 0.8)
    tm, tn, tk = _plan_linear_tiles(
        M, K, N,
        jnp.dtype(x2d.dtype).itemsize, jnp.dtype(w.dtype).itemsize,
        out_dtype.itemsize,
        jnp.dtype(residual.dtype).itemsize if residual is not None else 0,
        budget)
    grid = (M // tm, N // tn, K // tk)

    in_specs = [pl.BlockSpec((tm, tk), lambda i, j, k: (i, k)),
                pl.BlockSpec((tk, tn), lambda i, j, k: (k, j)),
                pl.BlockSpec((1, tn), lambda i, j, k: (0, j))]
    args = [x2d, w, b.reshape(1, N)]
    if residual is not None:
        in_specs.append(pl.BlockSpec((tm, tn), lambda i, j, k: (i, j)))
        args.append(residual)

    cost = pl.CostEstimate(
        flops=int(2 * M * N * K),
        transcendentals=int(M * N) if gelu else 0,
        bytes_accessed=int(jnp.dtype(x2d.dtype).itemsize * M * K
                           + jnp.dtype(w.dtype).itemsize * K * N
                           + out_dtype.itemsize * M * N
                           + (4 * M * N if residual is not None else 0) + 4 * N))

    return pl.pallas_call(
        functools.partial(_linear_kernel, gelu=gelu,
                          residual=residual is not None),
        out_shape=jax.ShapeDtypeStruct((M, N), out_dtype),
        grid=grid,
        in_specs=in_specs,
        out_specs=pl.BlockSpec((tm, tn), lambda i, j, k: (i, j)),
        scratch_shapes=[pltpu.VMEM((tm, tn), jnp.float32)],
        compiler_params=pltpu.CompilerParams(
            dimension_semantics=("parallel", "parallel", "arbitrary"),
            vmem_limit_bytes=_vmem_limit_bytes()),
        cost_estimate=cost,
    )(*args)


def pallas_ln_linear(x2d, gamma, beta, w, b, gelu=False, out_dtype=None):
    """Fused LayerNorm(x) @ W + b [+ GELU]; (M,N)-tiled, full K (LN axis).
    Normalized rows cached in bf16 VMEM scratch and reused across N tiles,
    so the N axis must stay 'arbitrary'."""
    M, K = x2d.shape
    N = w.shape[1]
    out_dtype = jnp.dtype(out_dtype if out_dtype is not None else x2d.dtype)
    budget = int(_vmem_limit_bytes() * 0.8)
    tm, tn = _plan_ln_tiles(M, K, N, jnp.dtype(x2d.dtype).itemsize,
                            out_dtype.itemsize, budget)
    grid = (M // tm, N // tn)

    cost = pl.CostEstimate(
        flops=int(2 * M * N * K + 8 * M * K),
        transcendentals=int(M + (M * N if gelu else 0)),
        bytes_accessed=int(4 * M * K + 2 * K * N + out_dtype.itemsize * M * N
                           + 8 * K + 4 * N))

    return pl.pallas_call(
        functools.partial(_ln_linear_kernel, gelu=gelu),
        out_shape=jax.ShapeDtypeStruct((M, N), out_dtype),
        grid=grid,
        in_specs=[pl.BlockSpec((tm, K), lambda i, j: (i, 0)),
                  pl.BlockSpec((1, K), lambda i, j: (0, 0)),
                  pl.BlockSpec((1, K), lambda i, j: (0, 0)),
                  pl.BlockSpec((K, tn), lambda i, j: (0, j)),
                  pl.BlockSpec((1, tn), lambda i, j: (0, j))],
        out_specs=pl.BlockSpec((tm, tn), lambda i, j: (i, j)),
        scratch_shapes=[pltpu.VMEM((tm, K), MM_DTYPE)],
        compiler_params=pltpu.CompilerParams(
            dimension_semantics=("parallel", "arbitrary"),
            vmem_limit_bytes=_vmem_limit_bytes()),
        cost_estimate=cost,
    )(x2d, gamma.reshape(1, K), beta.reshape(1, K), w, b.reshape(1, N))


def pallas_layernorm(x2d, gamma, beta):
    M, D = x2d.shape
    tm = _pick_tile(M, 512, 8)
    return pl.pallas_call(
        _layernorm_kernel,
        out_shape=jax.ShapeDtypeStruct((M, D), x2d.dtype),
        grid=(M // tm,),
        in_specs=[pl.BlockSpec((tm, D), lambda i: (i, 0)),
                  pl.BlockSpec((1, D), lambda i: (0, 0)),
                  pl.BlockSpec((1, D), lambda i: (0, 0))],
        out_specs=pl.BlockSpec((tm, D), lambda i: (i, 0)),
        compiler_params=pltpu.CompilerParams(
            dimension_semantics=("parallel",),
            vmem_limit_bytes=_vmem_limit_bytes()),
    )(x2d, gamma.reshape(1, D), beta.reshape(1, D))


def pallas_mha(q, k, v, scale, out_dtype=None):
    # q: [B*H, Sq, Dh]; k, v: [B*H, Sk, Dh]
    BH, Sq, Dh = q.shape
    Sk = k.shape[1]
    out_dtype = jnp.dtype(out_dtype if out_dtype is not None else q.dtype)
    budget = int(_vmem_limit_bytes() * 0.8)

    # batch G (batch, head) groups per grid step, keeping >= 2 grid blocks
    # (v7x's 2 TensorCores) and fitting the VMEM budget.
    g_cap = max(1, min(8, BH // 2))
    g_cands = _tile_candidates(BH, 1, cap=g_cap)

    def usage(g):
        return (2 * g * Sq * Dh * jnp.dtype(q.dtype).itemsize
                + 4 * g * Sk * Dh * jnp.dtype(k.dtype).itemsize
                + 2 * g * Sq * Dh * out_dtype.itemsize
                + 2 * g * Sq * Sk * 4)

    G = g_cands[-1]
    for g in g_cands:
        if usage(g) <= budget:
            G = g
            break

    cost = pl.CostEstimate(
        flops=int(4 * BH * Sq * Sk * Dh),
        transcendentals=int(BH * Sq * Sk),
        bytes_accessed=int(2 * (2 * BH * Sq * Dh + 2 * BH * Sk * Dh)))
    return pl.pallas_call(
        functools.partial(_attn_kernel, scale=scale),
        out_shape=jax.ShapeDtypeStruct((BH, Sq, Dh), out_dtype),
        grid=(BH // G,),
        in_specs=[pl.BlockSpec((G, Sq, Dh), lambda i: (i, 0, 0)),
                  pl.BlockSpec((G, Sk, Dh), lambda i: (i, 0, 0)),
                  pl.BlockSpec((G, Sk, Dh), lambda i: (i, 0, 0))],
        out_specs=pl.BlockSpec((G, Sq, Dh), lambda i: (i, 0, 0)),
        compiler_params=pltpu.CompilerParams(
            dimension_semantics=("parallel",),
            vmem_limit_bytes=_vmem_limit_bytes()),
        cost_estimate=cost,
    )(q, k, v)


# ------------------------- params (deterministic) ----------------------------
# Linear weights are stored as [in, out] (transpose of torch's [out, in]) and
# in bf16 (they feed the MXU in bf16 anyway); biases / LayerNorm params /
# embeddings stay f32. Forward semantics (x @ W + b) are identical.

def init_params(key, *, vocab_size, max_pos, dim, depth, num_heads, mlp_ratio,
                cross_interval):
    hid = int(dim * mlp_ratio)
    keys = iter(jax.random.split(key, 8 + depth * 16))

    def tn(shape, std=0.02):
        w = std * jax.random.truncated_normal(next(keys), -2.0, 2.0, shape,
                                              jnp.float32)
        return w.astype(MM_DTYPE)          # weights stored bf16 once, at init

    word_emb = 0.02 * jax.random.truncated_normal(
        next(keys), -2.0, 2.0, (vocab_size, dim), jnp.float32)
    word_emb = word_emb.at[0].set(0.0)     # padding_idx = 0
    pos_emb = jax.random.truncated_normal(next(keys), -2.0, 2.0,
                                          (1, max_pos, dim), jnp.float32)

    blocks = []
    for _ in range(depth):
        blocks.append(dict(
            ln1_g=jnp.ones((dim,), jnp.float32), ln1_b=jnp.zeros((dim,), jnp.float32),
            qkv_w=tn((dim, 3 * dim)), qkv_b=jnp.zeros((3 * dim,), jnp.float32),
            proj_w=tn((dim, dim)), proj_b=jnp.zeros((dim,), jnp.float32),
            ln2_g=jnp.ones((dim,), jnp.float32), ln2_b=jnp.zeros((dim,), jnp.float32),
            fc1_w=tn((dim, hid)), fc1_b=jnp.zeros((hid,), jnp.float32),
            fc2_w=tn((hid, dim)), fc2_b=jnp.zeros((dim,), jnp.float32),
        ))

    cross_idx = set(range(0, depth, cross_interval))
    cross = {}
    for i in sorted(cross_idx):
        cross[str(i)] = dict(
            q_w=tn((dim, dim)), q_b=jnp.zeros((dim,), jnp.float32),
            kv_w=tn((dim, 2 * dim)), kv_b=jnp.zeros((2 * dim,), jnp.float32),
            proj_w=tn((dim, dim)), proj_b=jnp.zeros((dim,), jnp.float32),
        )

    params = dict(word_emb=word_emb, pos_emb=pos_emb, blocks=blocks, cross=cross,
                  norm_g=jnp.ones((dim,), jnp.float32),
                  norm_b=jnp.zeros((dim,), jnp.float32))
    return params, cross_idx


# -------------------------------- forward ------------------------------------

def image_grounded_text_encoder(params, cross_idx, token_ids, image_feature, *,
                                num_heads):
    B, S = token_ids.shape
    D = params['word_emb'].shape[1]
    H = num_heads
    Dh = D // H
    scale = Dh ** -0.5
    N = image_feature.shape[1]

    # embedding gather + positional add (XLA glue, not the hot path)
    x = jnp.take(params['word_emb'], token_ids, axis=0)      # [B, S, D]
    x = x + params['pos_emb'][:, :S, :]
    x2d = x.reshape(B * S, D)                                 # f32 residual stream
    # pos_drop(rate=0.0) -> identity

    def split_qkv(qkv2d, seq):       # [B*seq, 3D] -> 3 x [B*H, seq, Dh]
        t = qkv2d.reshape(B, seq, 3, H, Dh).transpose(2, 0, 3, 1, 4)
        return (t[0].reshape(B * H, seq, Dh),
                t[1].reshape(B * H, seq, Dh),
                t[2].reshape(B * H, seq, Dh))

    def split_heads(t2d, seq):       # [B*seq, D] -> [B*H, seq, Dh]
        return t2d.reshape(B, seq, H, Dh).transpose(0, 2, 1, 3).reshape(B * H, seq, Dh)

    def merge_heads(t, seq):         # [B*H, seq, Dh] -> [B*seq, D]
        return t.reshape(B, H, seq, Dh).transpose(0, 2, 1, 3).reshape(B * seq, D)

    # Precompute cross-attention K/V of the loop-invariant image features for
    # ALL cross layers with one tiled linear (bf16 output), then split per layer.
    cross_order = sorted(cross_idx)
    cross_kv = {}
    if cross_order:
        kv_w_all = jnp.concatenate(
            [params['cross'][str(i)]['kv_w'] for i in cross_order], axis=1)
        kv_b_all = jnp.concatenate(
            [params['cross'][str(i)]['kv_b'] for i in cross_order], axis=0)
        kv_all = pallas_linear(image_feature.reshape(B * N, D), kv_w_all,
                               kv_b_all, out_dtype=MM_DTYPE)
        for slot, i in enumerate(cross_order):
            kv_i = kv_all[:, slot * 2 * D:(slot + 1) * 2 * D]        # [B*N, 2D]
            kv_t = kv_i.reshape(B, N, 2, H, Dh).transpose(2, 0, 3, 1, 4)
            cross_kv[i] = (kv_t[0].reshape(B * H, N, Dh),
                           kv_t[1].reshape(B * H, N, Dh))

    for i, blk in enumerate(params['blocks']):
        # ---- self-attention (pre-norm), drop_path rate 0 -> identity ----
        qkv = pallas_ln_linear(x2d, blk['ln1_g'], blk['ln1_b'],
                               blk['qkv_w'], blk['qkv_b'],
                               out_dtype=MM_DTYPE)                    # LN + QKV
        q, k, v = split_qkv(qkv, S)
        o = pallas_mha(q, k, v, scale)                                # bf16 out
        x2d = pallas_linear(merge_heads(o, S), blk['proj_w'], blk['proj_b'],
                            residual=x2d, out_dtype=jnp.float32)      # proj + residual

        # ---- MLP (pre-norm) ----
        h = pallas_ln_linear(x2d, blk['ln2_g'], blk['ln2_b'],
                             blk['fc1_w'], blk['fc1_b'], gelu=True,
                             out_dtype=MM_DTYPE)                      # LN + FC1 + GELU
        x2d = pallas_linear(h, blk['fc2_w'], blk['fc2_b'],
                            residual=x2d, out_dtype=jnp.float32)      # FC2 + residual

        # ---- cross-attention to image features ----
        if i in cross_idx:
            ca = params['cross'][str(i)]
            q = pallas_linear(x2d, ca['q_w'], ca['q_b'], out_dtype=MM_DTYPE)
            k, v = cross_kv[i]
            o = pallas_mha(split_heads(q, S), k, v, scale)
            x2d = pallas_linear(merge_heads(o, S), ca['proj_w'], ca['proj_b'],
                                residual=x2d, out_dtype=jnp.float32)  # proj + residual

    x2d = pallas_layernorm(x2d, params['norm_g'], params['norm_b'])
    return x2d.reshape(B, S, D)


# --------------------------------- main ---------------------------------------

if __name__ == "__main__":
    B, S, D, H, depth = 2, 8, 32, 4, 2
    vocab, max_pos, n_img = 50, 16, 16

    key = jax.random.PRNGKey(0)
    kp, kt, ki = jax.random.split(key, 3)

    params, cross_idx = init_params(kp, vocab_size=vocab, max_pos=max_pos, dim=D,
                                    depth=depth, num_heads=H, mlp_ratio=4.0,
                                    cross_interval=1)

    token_ids = jax.random.randint(kt, (B, S), 0, vocab, dtype=jnp.int32)
    image_feature = jax.random.normal(ki, (B, n_img, D), jnp.float32)

    fwd = jax.jit(lambda p, t, img: image_grounded_text_encoder(
        p, cross_idx, t, img, num_heads=H))

    out = fwd(params, token_ids, image_feature)
    out = jax.block_until_ready(out)
    assert out.shape == (B, S, D) and out.dtype == jnp.float32
    assert bool(jnp.all(jnp.isfinite(out)))
    print("KERNEL_OK")
</pallas_src>

<mosaic_0001>
module attributes {stable_mosaic.version = 11 : i64} {
  func.func @_ln_linear_kernel(%arg0: i32, %arg1: i32, %arg2: memref<16x32xf32, #tpu.memory_space<vmem>>, %arg3: memref<1x32xf32, #tpu.memory_space<vmem>>, %arg4: memref<1x32xf32, #tpu.memory_space<vmem>>, %arg5: memref<32x96xbf16, #tpu.memory_space<vmem>>, %arg6: memref<1x96xf32, #tpu.memory_space<vmem>>, %arg7: memref<16x96xbf16, #tpu.memory_space<vmem>>, %arg8: memref<16x32xbf16, #tpu.memory_space<vmem>>) attributes {dimension_semantics = [#tpu.dimension_semantics<parallel>, #tpu.dimension_semantics<arbitrary>], iteration_bounds = array<i64: 1, 1>, scalar_prefetch = 0 : i64, scratch_operands = 1 : i64, tpu.core_type = #tpu.core_type<tc>, window_params = [{transform_indices = @transform_0, window_bounds = array<i64: 16, 32>}, {pipeline_mode = #tpu.pipeline_mode<synchronous>, transform_indices = @transform_1, window_bounds = array<i64: 1, 32>}, {pipeline_mode = #tpu.pipeline_mode<synchronous>, transform_indices = @transform_2, window_bounds = array<i64: 1, 32>}, {transform_indices = @transform_3, window_bounds = array<i64: 32, 96>}, {transform_indices = @transform_4, window_bounds = array<i64: 1, 96>}, {transform_indices = @transform_5, window_bounds = array<i64: 16, 96>}]} {
    %c0_i32 = arith.constant 0 : i32
    %0 = arith.cmpi eq, %arg1, %c0_i32 : i32
    %1 = arith.extui %0 : i1 to i32
    %c0_i32_0 = arith.constant 0 : i32
    %2 = arith.cmpi ne, %1, %c0_i32_0 : i32
    scf.if %2 {
      %c0_8 = arith.constant 0 : index
      %c0_9 = arith.constant 0 : index
      %11 = vector.load %arg2[%c0_8, %c0_9] : memref<16x32xf32, #tpu.memory_space<vmem>>, vector<16x32xf32>
      %cst_10 = arith.constant dense<0.000000e+00> : vector<16xf32>
      %12 = vector.multi_reduction <add>, %11, %cst_10 [1] : vector<16x32xf32> to vector<16xf32>
      %13 = vector.shape_cast %12 : vector<16xf32> to vector<16x1xf32>
      %cst_11 = arith.constant 3.200000e+01 : f32
      %14 = vector.broadcast %cst_11 : f32 to vector<16x1xf32>
      %15 = arith.divf %13, %14 : vector<16x1xf32>
      %16 = vector.broadcast %15 : vector<16x1xf32> to vector<16x32xf32>
      %17 = arith.subf %11, %16 : vector<16x32xf32>
      %18 = arith.mulf %17, %17 : vector<16x32xf32>
      %cst_12 = arith.constant dense<0.000000e+00> : vector<16xf32>
      %19 = vector.multi_reduction <add>, %18, %cst_12 [1] : vector<16x32xf32> to vector<16xf32>
      %20 = vector.shape_cast %19 : vector<16xf32> to vector<16x1xf32>
      %cst_13 = arith.constant 3.200000e+01 : f32
      %21 = vector.broadcast %cst_13 : f32 to vector<16x1xf32>
      %22 = arith.divf %20, %21 : vector<16x1xf32>
      %23 = vector.broadcast %15 : vector<16x1xf32> to vector<16x32xf32>
      %24 = arith.subf %11, %23 : vector<16x32xf32>
      %cst_14 = arith.constant 9.99999974E-6 : f32
      %25 = vector.broadcast %cst_14 : f32 to vector<16x1xf32>
      %26 = arith.addf %22, %25 : vector<16x1xf32>
      %27 = math.rsqrt %26 : vector<16x1xf32>
      %28 = vector.broadcast %27 : vector<16x1xf32> to vector<16x32xf32>
      %29 = arith.mulf %24, %28 : vector<16x32xf32>
      %c0_15 = arith.constant 0 : index
      %c0_16 = arith.constant 0 : index
      %30 = vector.load %arg3[%c0_15, %c0_16] : memref<1x32xf32, #tpu.memory_space<vmem>>, vector<1x32xf32>
      %31 = vector.broadcast %30 : vector<1x32xf32> to vector<16x32xf32>
      %32 = arith.mulf %29, %31 : vector<16x32xf32>
      %c0_17 = arith.constant 0 : index
      %c0_18 = arith.constant 0 : index
      %33 = vector.load %arg4[%c0_17, %c0_18] : memref<1x32xf32, #tpu.memory_space<vmem>>, vector<1x32xf32>
      %34 = vector.broadcast %33 : vector<1x32xf32> to vector<16x32xf32>
      %35 = arith.addf %32, %34 : vector<16x32xf32>
      %36 = arith.truncf %35 : vector<16x32xf32> to vector<16x32xbf16>
      %c0_19 = arith.constant 0 : index
      %c0_20 = arith.constant 0 : index
      %37 = vector.load %arg8[%c0_19, %c0_20] : memref<16x32xbf16, #tpu.memory_space<vmem>>, vector<16x32xbf16>
      tpu.vector_store %arg8[%c0_19, %c0_20], %36 {strides = array<i32>} : memref<16x32xbf16, #tpu.memory_space<vmem>>, vector<16x32xbf16>,
    } else {
    }
    %c0 = arith.constant 0 : index
    %c0_1 = arith.constant 0 : index
    %3 = vector.load %arg8[%c0, %c0_1] : memref<16x32xbf16, #tpu.memory_space<vmem>>, vector<16x32xbf16>
    %c0_2 = arith.constant 0 : index
    %c0_3 = arith.constant 0 : index
    %4 = vector.load %arg5[%c0_2, %c0_3] : memref<32x96xbf16, #tpu.memory_space<vmem>>, vector<32x96xbf16>
    %cst = arith.constant dense<0.000000e+00> : vector<16x96xf32>
    %5 = tpu.matmul %3, %4, %cst {dimension_numbers = #tpu.dot_dimension_numbers<[1], [0], [0], [1], [0, 0, 1, 1], [], []>} : vector<16x32xbf16>, vector<32x96xbf16>, vector<16x96xf32> -> vector<16x96xf32>
    %c0_4 = arith.constant 0 : index
    %c0_5 = arith.constant 0 : index
    %6 = vector.load %arg6[%c0_4, %c0_5] : memref<1x96xf32, #tpu.memory_space<vmem>>, vector<1x96xf32>
    %7 = vector.broadcast %6 : vector<1x96xf32> to vector<16x96xf32>
    %8 = arith.addf %5, %7 : vector<16x96xf32>
    %9 = arith.truncf %8 : vector<16x96xf32> to vector<16x96xbf16>
    %c0_6 = arith.constant 0 : index
    %c0_7 = arith.constant 0 : index
    %10 = vector.load %arg7[%c0_6, %c0_7] : memref<16x96xbf16, #tpu.memory_space<vmem>>, vector<16x96xbf16>
    tpu.vector_store %arg7[%c0_6, %c0_7], %9 {strides = array<i32>} : memref<16x96xbf16, #tpu.memory_space<vmem>>, vector<16x96xbf16>,
    return
  }
  func.func @transform_0(%arg0: i32, %arg1: i32) -> (i32, i32) {
    %c0_i32 = arith.constant 0 : i32
    %c0_i32_0 = arith.constant 0 : i32
    return %arg0, %c0_i32 : i32, i32
  }
  func.func @transform_1(%arg0: i32, %arg1: i32) -> (i32, i32) {
    %c0_i32 = arith.constant 0 : i32
    %c0_i32_0 = arith.constant 0 : i32
    %c0_i32_1 = arith.constant 0 : i32
    return %c0_i32, %c0_i32_0 : i32, i32
  }
  func.func @transform_2(%arg0: i32, %arg1: i32) -> (i32, i32) {
    %c0_i32 = arith.constant 0 : i32
    %c0_i32_0 = arith.constant 0 : i32
    %c0_i32_1 = arith.constant 0 : i32
    return %c0_i32, %c0_i32_0 : i32, i32
  }
  func.func @transform_3(%arg0: i32, %arg1: i32) -> (i32, i32) {
    %c0_i32 = arith.constant 0 : i32
    %c0_i32_0 = arith.constant 0 : i32
    return %c0_i32, %arg1 : i32, i32
  }
  func.func @transform_4(%arg0: i32, %arg1: i32) -> (i32, i32) {
    %c0_i32 = arith.constant 0 : i32
    %c0_i32_0 = arith.constant 0 : i32
    return %c0_i32, %arg1 : i32, i32
  }
  func.func @transform_5(%arg0: i32, %arg1: i32) -> (i32, i32) {
    %c0_i32 = arith.constant 0 : i32
    return %arg0, %arg1 : i32, i32
  }
}

module attributes {stable_mosaic.version = 11 : i64} {
  func.func @_attn_kernel(%arg0: i32, %arg1: memref<4x8x8xbf16, #tpu.memory_space<vmem>>, %arg2: memref<4x8x8xbf16, #tpu.memory_space<vmem>>, %arg3: memref<4x8x8xbf16, #tpu.memory_space<vmem>>, %arg4: memref<4x8x8xbf16, #tpu.memory_space<vmem>>) attributes {dimension_semantics = [#tpu.dimension_semantics<parallel>], iteration_bounds = array<i64: 2>, scalar_prefetch = 0 : i64, scratch_operands = 0 : i64, tpu.core_type = #tpu.core_type<tc>, window_params = [{transform_indices = @transform_0, window_bounds = array<i64: 4, 8, 8>}, {transform_indices = @transform_1, window_bounds = array<i64: 4, 8, 8>}, {transform_indices = @transform_2, window_bounds = array<i64: 4, 8, 8>}, {transform_indices = @transform_3, window_bounds = array<i64: 4, 8, 8>}]} {
    %c0 = arith.constant 0 : index
    %c0_0 = arith.constant 0 : index
    %c0_1 = arith.constant 0 : index
    %0 = vector.load %arg1[%c0, %c0_0, %c0_1] : memref<4x8x8xbf16, #tpu.memory_space<vmem>>, vector<4x8x8xbf16>
    %1 = arith.extf %0 : vector<4x8x8xbf16> to vector<4x8x8xf32>
    %cst = arith.constant 0.353553385 : f32
    %2 = vector.broadcast %cst : f32 to vector<4x8x8xf32>
    %3 = arith.mulf %1, %2 : vector<4x8x8xf32>
    %4 = arith.truncf %3 : vector<4x8x8xf32> to vector<4x8x8xbf16>
    %c0_2 = arith.constant 0 : index
    %c0_3 = arith.constant 0 : index
    %c0_4 = arith.constant 0 : index
    %5 = vector.load %arg2[%c0_2, %c0_3, %c0_4] : memref<4x8x8xbf16, #tpu.memory_space<vmem>>, vector<4x8x8xbf16>
    %c0_5 = arith.constant 0 : index
    %c0_6 = arith.constant 0 : index
    %c0_7 = arith.constant 0 : index
    %6 = vector.load %arg3[%c0_5, %c0_6, %c0_7] : memref<4x8x8xbf16, #tpu.memory_space<vmem>>, vector<4x8x8xbf16>
    "tpu.trace_start"() <{level = 10 : i32, message = "gqd,gkd->gqk"}> : () -> ()
    %cst_8 = arith.constant dense<0.000000e+00> : vector<4x8x8xf32>
    %7 = tpu.matmul %4, %5, %cst_8 {dimension_numbers = #tpu.dot_dimension_numbers<[2], [2], [1], [1], [0, 0, 0, 1, 1, 1], [0], [0]>} : vector<4x8x8xbf16>, vector<4x8x8xbf16>, vector<4x8x8xf32> -> vector<4x8x8xf32>
    "tpu.trace_stop"() : () -> ()
    %cst_9 = arith.constant dense<0xFF800000> : vector<4x8xf32>
    %8 = vector.multi_reduction <maximumf>, %7, %cst_9 [2] : vector<4x8x8xf32> to vector<4x8xf32>
    %9 = vector.shape_cast %8 : vector<4x8xf32> to vector<4x8x1xf32>
    %10 = vector.broadcast %9 : vector<4x8x1xf32> to vector<4x8x8xf32>
    %11 = arith.subf %7, %10 : vector<4x8x8xf32>
    %12 = math.exp %11 : vector<4x8x8xf32>
    %cst_10 = arith.constant dense<0.000000e+00> : vector<4x8xf32>
    %13 = vector.multi_reduction <add>, %12, %cst_10 [2] : vector<4x8x8xf32> to vector<4x8xf32>
    %14 = vector.shape_cast %13 : vector<4x8xf32> to vector<4x8x1xf32>
    %15 = arith.truncf %12 : vector<4x8x8xf32> to vector<4x8x8xbf16>
    "tpu.trace_start"() <{level = 10 : i32, message = "gqk,gkd->gqd"}> : () -> ()
    %cst_11 = arith.constant dense<0.000000e+00> : vector<4x8x8xf32>
    %16 = tpu.matmul %15, %6, %cst_11 {dimension_numbers = #tpu.dot_dimension_numbers<[2], [1], [1], [2], [0, 0, 0, 1, 1, 2], [0], [0]>} : vector<4x8x8xbf16>, vector<4x8x8xbf16>, vector<4x8x8xf32> -> vector<4x8x8xf32>
    "tpu.trace_stop"() : () -> ()
    %17 = tpu.reciprocal %14 {approx = true} : vector<4x8x1xf32> -> vector<4x8x1xf32>
    %18 = vector.broadcast %17 : vector<4x8x1xf32> to vector<4x8x8xf32>
    %19 = arith.mulf %16, %18 : vector<4x8x8xf32>
    %20 = arith.truncf %19 : vector<4x8x8xf32> to vector<4x8x8xbf16>
    %c0_12 = arith.constant 0 : index
    %c0_13 = arith.constant 0 : index
    %c0_14 = arith.constant 0 : index
    %21 = vector.load %arg4[%c0_12, %c0_13, %c0_14] : memref<4x8x8xbf16, #tpu.memory_space<vmem>>, vector<4x8x8xbf16>
    tpu.vector_store %arg4[%c0_12, %c0_13, %c0_14], %20 {strides = array<i32>} : memref<4x8x8xbf16, #tpu.memory_space<vmem>>, vector<4x8x8xbf16>,
    return
  }
  func.func @transform_0(%arg0: i32) -> (i32, i32, i32) {
    %c0_i32 = arith.constant 0 : i32
    %c0_i32_0 = arith.constant 0 : i32
    %c0_i32_1 = arith.constant 0 : i32
    return %arg0, %c0_i32, %c0_i32_0 : i32, i32, i32
  }
  func.func @transform_1(%arg0: i32) -> (i32, i32, i32) {
    %c0_i32 = arith.constant 0 : i32
    %c0_i32_0 = arith.constant 0 : i32
    %c0_i32_1 = arith.constant 0 : i32
    return %arg0, %c0_i32, %c0_i32_0 : i32, i32, i32
  }
  func.func @transform_2(%arg0: i32) -> (i32, i32, i32) {
    %c0_i32 = arith.constant 0 : i32
    %c0_i32_0 = arith.constant 0 : i32
    %c0_i32_1 = arith.constant 0 : i32
    return %arg0, %c0_i32, %c0_i32_0 : i32, i32, i32
  }
  func.func @transform_3(%arg0: i32) -> (i32, i32, i32) {
    %c0_i32 = arith.constant 0 : i32
    %c0_i32_0 = arith.constant 0 : i32
    %c0_i32_1 = arith.constant 0 : i32
    return %arg0, %c0_i32, %c0_i32_0 : i32, i32, i32
  }
}

module attributes {stable_mosaic.version = 11 : i64} {
  func.func @_linear_kernel(%arg0: i32, %arg1: i32, %arg2: i32, %arg3: memref<16x32xbf16, #tpu.memory_space<vmem>>, %arg4: memref<32x32xbf16, #tpu.memory_space<vmem>>, %arg5: memref<1x32xf32, #tpu.memory_space<vmem>>, %arg6: memref<16x32xf32, #tpu.memory_space<vmem>>, %arg7: memref<16x32xf32, #tpu.memory_space<vmem>>, %arg8: memref<16x32xf32, #tpu.memory_space<vmem>>) attributes {dimension_semantics = [#tpu.dimension_semantics<parallel>, #tpu.dimension_semantics<parallel>, #tpu.dimension_semantics<arbitrary>], iteration_bounds = array<i64: 1, 1, 1>, scalar_prefetch = 0 : i64, scratch_operands = 1 : i64, tpu.core_type = #tpu.core_type<tc>, window_params = [{transform_indices = @transform_0, window_bounds = array<i64: 16, 32>}, {transform_indices = @transform_1, window_bounds = array<i64: 32, 32>}, {transform_indices = @transform_2, window_bounds = array<i64: 1, 32>}, {transform_indices = @transform_3, window_bounds = array<i64: 16, 32>}, {transform_indices = @transform_4, window_bounds = array<i64: 16, 32>}]} {
    %c0_i32 = arith.constant 0 : i32
    %0 = arith.cmpi eq, %arg2, %c0_i32 : i32
    %1 = arith.extui %0 : i1 to i32
    %c0_i32_0 = arith.constant 0 : i32
    %2 = arith.cmpi ne, %1, %c0_i32_0 : i32
    scf.if %2 {
      %cst_10 = arith.constant 0.000000e+00 : f32
      %12 = vector.broadcast %cst_10 : f32 to vector<16x32xf32>
      %c0_11 = arith.constant 0 : index
      %c0_12 = arith.constant 0 : index
      %13 = vector.load %arg8[%c0_11, %c0_12] : memref<16x32xf32, #tpu.memory_space<vmem>>, vector<16x32xf32>
      tpu.vector_store %arg8[%c0_11, %c0_12], %12 {strides = array<i32>} : memref<16x32xf32, #tpu.memory_space<vmem>>, vector<16x32xf32>,
    } else {
    }
    %c0 = arith.constant 0 : index
    %c0_1 = arith.constant 0 : index
    %3 = vector.load %arg8[%c0, %c0_1] : memref<16x32xf32, #tpu.memory_space<vmem>>, vector<16x32xf32>
    %c0_2 = arith.constant 0 : index
    %c0_3 = arith.constant 0 : index
    %4 = vector.load %arg3[%c0_2, %c0_3] : memref<16x32xbf16, #tpu.memory_space<vmem>>, vector<16x32xbf16>
    %c0_4 = arith.constant 0 : index
    %c0_5 = arith.constant 0 : index
    %5 = vector.load %arg4[%c0_4, %c0_5] : memref<32x32xbf16, #tpu.memory_space<vmem>>, vector<32x32xbf16>
    %cst = arith.constant dense<0.000000e+00> : vector<16x32xf32>
    %6 = tpu.matmul %4, %5, %cst {dimension_numbers = #tpu.dot_dimension_numbers<[1], [0], [0], [1], [0, 0, 1, 1], [], []>} : vector<16x32xbf16>, vector<32x32xbf16>, vector<16x32xf32> -> vector<16x32xf32>
    %7 = arith.addf %3, %6 : vector<16x32xf32>
    %c0_6 = arith.constant 0 : index
    %c0_7 = arith.constant 0 : index
    %8 = vector.load %arg8[%c0_6, %c0_7] : memref<16x32xf32, #tpu.memory_space<vmem>>, vector<16x32xf32>
    tpu.vector_store %arg8[%c0_6, %c0_7], %7 {strides = array<i32>} : memref<16x32xf32, #tpu.memory_space<vmem>>, vector<16x32xf32>,
    %c0_i32_8 = arith.constant 0 : i32
    %9 = arith.cmpi eq, %arg2, %c0_i32_8 : i32
    %10 = arith.extui %9 : i1 to i32
    %c0_i32_9 = arith.constant 0 : i32
    %11 = arith.cmpi ne, %10, %c0_i32_9 : i32
    scf.if %11 {
      %c0_10 = arith.constant 0 : index
      %c0_11 = arith.constant 0 : index
      %12 = vector.load %arg8[%c0_10, %c0_11] : memref<16x32xf32, #tpu.memory_space<vmem>>, vector<16x32xf32>
      %c0_12 = arith.constant 0 : index
      %c0_13 = arith.constant 0 : index
      %13 = vector.load %arg5[%c0_12, %c0_13] : memref<1x32xf32, #tpu.memory_space<vmem>>, vector<1x32xf32>
      %14 = vector.broadcast %13 : vector<1x32xf32> to vector<16x32xf32>
      %15 = arith.addf %12, %14 : vector<16x32xf32>
      %c0_14 = arith.constant 0 : index
      %c0_15 = arith.constant 0 : index
      %16 = vector.load %arg6[%c0_14, %c0_15] : memref<16x32xf32, #tpu.memory_space<vmem>>, vector<16x32xf32>
      %17 = arith.addf %15, %16 : vector<16x32xf32>
      %c0_16 = arith.constant 0 : index
      %c0_17 = arith.constant 0 : index
      %18 = vector.load %arg7[%c0_16, %c0_17] : memref<16x32xf32, #tpu.memory_space<vmem>>, vector<16x32xf32>
      tpu.vector_store %arg7[%c0_16, %c0_17], %17 {strides = array<i32>} : memref<16x32xf32, #tpu.memory_space<vmem>>, vector<16x32xf32>,
    } else {
    }
    return
  }
  func.func @transform_0(%arg0: i32, %arg1: i32, %arg2: i32) -> (i32, i32) {
    %c0_i32 = arith.constant 0 : i32
    return %arg0, %arg2 : i32, i32
  }
  func.func @transform_1(%arg0: i32, %arg1: i32, %arg2: i32) -> (i32, i32) {
    %c0_i32 = arith.constant 0 : i32
    return %arg2, %arg1 : i32, i32
  }
  func.func @transform_2(%arg0: i32, %arg1: i32, %arg2: i32) -> (i32, i32) {
    %c0_i32 = arith.constant 0 : i32
    %c0_i32_0 = arith.constant 0 : i32
    return %c0_i32, %arg1 : i32, i32
  }
  func.func @transform_3(%arg0: i32, %arg1: i32, %arg2: i32) -> (i32, i32) {
    %c0_i32 = arith.constant 0 : i32
    return %arg0, %arg1 : i32, i32
  }
  func.func @transform_4(%arg0: i32, %arg1: i32, %arg2: i32) -> (i32, i32) {
    %c0_i32 = arith.constant 0 : i32
    return %arg0, %arg1 : i32, i32
  }
}

module attributes {stable_mosaic.version = 11 : i64} {
  func.func @_ln_linear_kernel(%arg0: i32, %arg1: i32, %arg2: memref<16x32xf32, #tpu.memory_space<vmem>>, %arg3: memref<1x32xf32, #tpu.memory_space<vmem>>, %arg4: memref<1x32xf32, #tpu.memory_space<vmem>>, %arg5: memref<32x128xbf16, #tpu.memory_space<vmem>>, %arg6: memref<1x128xf32, #tpu.memory_space<vmem>>, %arg7: memref<16x128xbf16, #tpu.memory_space<vmem>>, %arg8: memref<16x32xbf16, #tpu.memory_space<vmem>>) attributes {dimension_semantics = [#tpu.dimension_semantics<parallel>, #tpu.dimension_semantics<arbitrary>], iteration_bounds = array<i64: 1, 1>, scalar_prefetch = 0 : i64, scratch_operands = 1 : i64, tpu.core_type = #tpu.core_type<tc>, window_params = [{transform_indices = @transform_0, window_bounds = array<i64: 16, 32>}, {pipeline_mode = #tpu.pipeline_mode<synchronous>, transform_indices = @transform_1, window_bounds = array<i64: 1, 32>}, {pipeline_mode = #tpu.pipeline_mode<synchronous>, transform_indices = @transform_2, window_bounds = array<i64: 1, 32>}, {transform_indices = @transform_3, window_bounds = array<i64: 32, 128>}, {transform_indices = @transform_4, window_bounds = array<i64: 1, 128>}, {transform_indices = @transform_5, window_bounds = array<i64: 16, 128>}]} {
    %c0_i32 = arith.constant 0 : i32
    %0 = arith.cmpi eq, %arg1, %c0_i32 : i32
    %1 = arith.extui %0 : i1 to i32
    %c0_i32_0 = arith.constant 0 : i32
    %2 = arith.cmpi ne, %1, %c0_i32_0 : i32
    scf.if %2 {
      %c0_11 = arith.constant 0 : index
      %c0_12 = arith.constant 0 : index
      %19 = vector.load %arg2[%c0_11, %c0_12] : memref<16x32xf32, #tpu.memory_space<vmem>>, vector<16x32xf32>
      %cst_13 = arith.constant dense<0.000000e+00> : vector<16xf32>
      %20 = vector.multi_reduction <add>, %19, %cst_13 [1] : vector<16x32xf32> to vector<16xf32>
      %21 = vector.shape_cast %20 : vector<16xf32> to vector<16x1xf32>
      %cst_14 = arith.constant 3.200000e+01 : f32
      %22 = vector.broadcast %cst_14 : f32 to vector<16x1xf32>
      %23 = arith.divf %21, %22 : vector<16x1xf32>
      %24 = vector.broadcast %23 : vector<16x1xf32> to vector<16x32xf32>
      %25 = arith.subf %19, %24 : vector<16x32xf32>
      %26 = arith.mulf %25, %25 : vector<16x32xf32>
      %cst_15 = arith.constant dense<0.000000e+00> : vector<16xf32>
      %27 = vector.multi_reduction <add>, %26, %cst_15 [1] : vector<16x32xf32> to vector<16xf32>
      %28 = vector.shape_cast %27 : vector<16xf32> to vector<16x1xf32>
      %cst_16 = arith.constant 3.200000e+01 : f32
      %29 = vector.broadcast %cst_16 : f32 to vector<16x1xf32>
      %30 = arith.divf %28, %29 : vector<16x1xf32>
      %31 = vector.broadcast %23 : vector<16x1xf32> to vector<16x32xf32>
      %32 = arith.subf %19, %31 : vector<16x32xf32>
      %cst_17 = arith.constant 9.99999974E-6 : f32
      %33 = vector.broadcast %cst_17 : f32 to vector<16x1xf32>
      %34 = arith.addf %30, %33 : vector<16x1xf32>
      %35 = math.rsqrt %34 : vector<16x1xf32>
      %36 = vector.broadcast %35 : vector<16x1xf32> to vector<16x32xf32>
      %37 = arith.mulf %32, %36 : vector<16x32xf32>
      %c0_18 = arith.constant 0 : index
      %c0_19 = arith.constant 0 : index
      %38 = vector.load %arg3[%c0_18, %c0_19] : memref<1x32xf32, #tpu.memory_space<vmem>>, vector<1x32xf32>
      %39 = vector.broadcast %38 : vector<1x32xf32> to vector<16x32xf32>
      %40 = arith.mulf %37, %39 : vector<16x32xf32>
      %c0_20 = arith.constant 0 : index
      %c0_21 = arith.constant 0 : index
      %41 = vector.load %arg4[%c0_20, %c0_21] : memref<1x32xf32, #tpu.memory_space<vmem>>, vector<1x32xf32>
      %42 = vector.broadcast %41 : vector<1x32xf32> to vector<16x32xf32>
      %43 = arith.addf %40, %42 : vector<16x32xf32>
      %44 = arith.truncf %43 : vector<16x32xf32> to vector<16x32xbf16>
      %c0_22 = arith.constant 0 : index
      %c0_23 = arith.constant 0 : index
      %45 = vector.load %arg8[%c0_22, %c0_23] : memref<16x32xbf16, #tpu.memory_space<vmem>>, vector<16x32xbf16>
      tpu.vector_store %arg8[%c0_22, %c0_23], %44 {strides = array<i32>} : memref<16x32xbf16, #tpu.memory_space<vmem>>, vector<16x32xbf16>,
    } else {
    }
    %c0 = arith.constant 0 : index
    %c0_1 = arith.constant 0 : index
    %3 = vector.load %arg8[%c0, %c0_1] : memref<16x32xbf16, #tpu.memory_space<vmem>>, vector<16x32xbf16>
    %c0_2 = arith.constant 0 : index
    %c0_3 = arith.constant 0 : index
    %4 = vector.load %arg5[%c0_2, %c0_3] : memref<32x128xbf16, #tpu.memory_space<vmem>>, vector<32x128xbf16>
    %cst = arith.constant dense<0.000000e+00> : vector<16x128xf32>
    %5 = tpu.matmul %3, %4, %cst {dimension_numbers = #tpu.dot_dimension_numbers<[1], [0], [0], [1], [0, 0, 1, 1], [], []>} : vector<16x32xbf16>, vector<32x128xbf16>, vector<16x128xf32> -> vector<16x128xf32>
    %c0_4 = arith.constant 0 : index
    %c0_5 = arith.constant 0 : index
    %6 = vector.load %arg6[%c0_4, %c0_5] : memref<1x128xf32, #tpu.memory_space<vmem>>, vector<1x128xf32>
    %7 = vector.broadcast %6 : vector<1x128xf32> to vector<16x128xf32>
    %8 = arith.addf %5, %7 : vector<16x128xf32>
    %cst_6 = arith.constant 5.000000e-01 : f32
    %9 = vector.broadcast %cst_6 : f32 to vector<16x128xf32>
    %10 = arith.mulf %9, %8 : vector<16x128xf32>
    %cst_7 = arith.constant 0.707106769 : f32
    %11 = vector.broadcast %cst_7 : f32 to vector<16x128xf32>
    %12 = arith.mulf %8, %11 : vector<16x128xf32>
    %13 = math.erf %12 : vector<16x128xf32>
    %cst_8 = arith.constant 1.000000e+00 : f32
    %14 = vector.broadcast %cst_8 : f32 to vector<16x128xf32>
    %15 = arith.addf %14, %13 : vector<16x128xf32>
    %16 = arith.mulf %10, %15 : vector<16x128xf32>
    %17 = arith.truncf %16 : vector<16x128xf32> to vector<16x128xbf16>
    %c0_9 = arith.constant 0 : index
    %c0_10 = arith.constant 0 : index
    %18 = vector.load %arg7[%c0_9, %c0_10] : memref<16x128xbf16, #tpu.memory_space<vmem>>, vector<16x128xbf16>
    tpu.vector_store %arg7[%c0_9, %c0_10], %17 {strides = array<i32>} : memref<16x128xbf16, #tpu.memory_space<vmem>>, vector<16x128xbf16>,
    return
  }
  func.func @transform_0(%arg0: i32, %arg1: i32) -> (i32, i32) {
    %c0_i32 = arith.constant 0 : i32
    %c0_i32_0 = arith.constant 0 : i32
    return %arg0, %c0_i32 : i32, i32
  }
  func.func @transform_1(%arg0: i32, %arg1: i32) -> (i32, i32) {
    %c0_i32 = arith.constant 0 : i32
    %c0_i32_0 = arith.constant 0 : i32
    %c0_i32_1 = arith.constant 0 : i32
    return %c0_i32, %c0_i32_0 : i32, i32
  }
  func.func @transform_2(%arg0: i32, %arg1: i32) -> (i32, i32) {
    %c0_i32 = arith.constant 0 : i32
    %c0_i32_0 = arith.constant 0 : i32
    %c0_i32_1 = arith.constant 0 : i32
    return %c0_i32, %c0_i32_0 : i32, i32
  }
  func.func @transform_3(%arg0: i32, %arg1: i32) -> (i32, i32) {
    %c0_i32 = arith.constant 0 : i32
    %c0_i32_0 = arith.constant 0 : i32
    return %c0_i32, %arg1 : i32, i32
  }
  func.func @transform_4(%arg0: i32, %arg1: i32) -> (i32, i32) {
    %c0_i32 = arith.constant 0 : i32
    %c0_i32_0 = arith.constant 0 : i32
    return %c0_i32, %arg1 : i32, i32
  }
  func.func @transform_5(%arg0: i32, %arg1: i32) -> (i32, i32) {
    %c0_i32 = arith.constant 0 : i32
    return %arg0, %arg1 : i32, i32
  }
}

module attributes {stable_mosaic.version = 11 : i64} {
  func.func @_linear_kernel(%arg0: i32, %arg1: i32, %arg2: i32, %arg3: memref<16x128xbf16, #tpu.memory_space<vmem>>, %arg4: memref<128x32xbf16, #tpu.memory_space<vmem>>, %arg5: memref<1x32xf32, #tpu.memory_space<vmem>>, %arg6: memref<16x32xf32, #tpu.memory_space<vmem>>, %arg7: memref<16x32xf32, #tpu.memory_space<vmem>>, %arg8: memref<16x32xf32, #tpu.memory_space<vmem>>) attributes {dimension_semantics = [#tpu.dimension_semantics<parallel>, #tpu.dimension_semantics<parallel>, #tpu.dimension_semantics<arbitrary>], iteration_bounds = array<i64: 1, 1, 1>, scalar_prefetch = 0 : i64, scratch_operands = 1 : i64, tpu.core_type = #tpu.core_type<tc>, window_params = [{transform_indices = @transform_0, window_bounds = array<i64: 16, 128>}, {transform_indices = @transform_1, window_bounds = array<i64: 128, 32>}, {transform_indices = @transform_2, window_bounds = array<i64: 1, 32>}, {transform_indices = @transform_3, window_bounds = array<i64: 16, 32>}, {transform_indices = @transform_4, window_bounds = array<i64: 16, 32>}]} {
    %c0_i32 = arith.constant 0 : i32
    %0 = arith.cmpi eq, %arg2, %c0_i32 : i32
    %1 = arith.extui %0 : i1 to i32
    %c0_i32_0 = arith.constant 0 : i32
    %2 = arith.cmpi ne, %1, %c0_i32_0 : i32
    scf.if %2 {
      %cst_10 = arith.constant 0.000000e+00 : f32
      %12 = vector.broadcast %cst_10 : f32 to vector<16x32xf32>
      %c0_11 = arith.constant 0 : index
      %c0_12 = arith.constant 0 : index
      %13 = vector.load %arg8[%c0_11, %c0_12] : memref<16x32xf32, #tpu.memory_space<vmem>>, vector<16x32xf32>
      tpu.vector_store %arg8[%c0_11, %c0_12], %12 {strides = array<i32>} : memref<16x32xf32, #tpu.memory_space<vmem>>, vector<16x32xf32>,
    } else {
    }
    %c0 = arith.constant 0 : index
    %c0_1 = arith.constant 0 : index
    %3 = vector.load %arg8[%c0, %c0_1] : memref<16x32xf32, #tpu.memory_space<vmem>>, vector<16x32xf32>
    %c0_2 = arith.constant 0 : index
    %c0_3 = arith.constant 0 : index
    %4 = vector.load %arg3[%c0_2, %c0_3] : memref<16x128xbf16, #tpu.memory_space<vmem>>, vector<16x128xbf16>
    %c0_4 = arith.constant 0 : index
    %c0_5 = arith.constant 0 : index
    %5 = vector.load %arg4[%c0_4, %c0_5] : memref<128x32xbf16, #tpu.memory_space<vmem>>, vector<128x32xbf16>
    %cst = arith.constant dense<0.000000e+00> : vector<16x32xf32>
    %6 = tpu.matmul %4, %5, %cst {dimension_numbers = #tpu.dot_dimension_numbers<[1], [0], [0], [1], [0, 0, 1, 1], [], []>} : vector<16x128xbf16>, vector<128x32xbf16>, vector<16x32xf32> -> vector<16x32xf32>
    %7 = arith.addf %3, %6 : vector<16x32xf32>
    %c0_6 = arith.constant 0 : index
    %c0_7 = arith.constant 0 : index
    %8 = vector.load %arg8[%c0_6, %c0_7] : memref<16x32xf32, #tpu.memory_space<vmem>>, vector<16x32xf32>
    tpu.vector_store %arg8[%c0_6, %c0_7], %7 {strides = array<i32>} : memref<16x32xf32, #tpu.memory_space<vmem>>, vector<16x32xf32>,
    %c0_i32_8 = arith.constant 0 : i32
    %9 = arith.cmpi eq, %arg2, %c0_i32_8 : i32
    %10 = arith.extui %9 : i1 to i32
    %c0_i32_9 = arith.constant 0 : i32
    %11 = arith.cmpi ne, %10, %c0_i32_9 : i32
    scf.if %11 {
      %c0_10 = arith.constant 0 : index
      %c0_11 = arith.constant 0 : index
      %12 = vector.load %arg8[%c0_10, %c0_11] : memref<16x32xf32, #tpu.memory_space<vmem>>, vector<16x32xf32>
      %c0_12 = arith.constant 0 : index
      %c0_13 = arith.constant 0 : index
      %13 = vector.load %arg5[%c0_12, %c0_13] : memref<1x32xf32, #tpu.memory_space<vmem>>, vector<1x32xf32>
      %14 = vector.broadcast %13 : vector<1x32xf32> to vector<16x32xf32>
      %15 = arith.addf %12, %14 : vector<16x32xf32>
      %c0_14 = arith.constant 0 : index
      %c0_15 = arith.constant 0 : index
      %16 = vector.load %arg6[%c0_14, %c0_15] : memref<16x32xf32, #tpu.memory_space<vmem>>, vector<16x32xf32>
      %17 = arith.addf %15, %16 : vector<16x32xf32>
      %c0_16 = arith.constant 0 : index
      %c0_17 = arith.constant 0 : index
      %18 = vector.load %arg7[%c0_16, %c0_17] : memref<16x32xf32, #tpu.memory_space<vmem>>, vector<16x32xf32>
      tpu.vector_store %arg7[%c0_16, %c0_17], %17 {strides = array<i32>} : memref<16x32xf32, #tpu.memory_space<vmem>>, vector<16x32xf32>,
    } else {
    }
    return
  }
  func.func @transform_0(%arg0: i32, %arg1: i32, %arg2: i32) -> (i32, i32) {
    %c0_i32 = arith.constant 0 : i32
    return %arg0, %arg2 : i32, i32
  }
  func.func @transform_1(%arg0: i32, %arg1: i32, %arg2: i32) -> (i32, i32) {
    %c0_i32 = arith.constant 0 : i32
    return %arg2, %arg1 : i32, i32
  }
  func.func @transform_2(%arg0: i32, %arg1: i32, %arg2: i32) -> (i32, i32) {
    %c0_i32 = arith.constant 0 : i32
    %c0_i32_0 = arith.constant 0 : i32
    return %c0_i32, %arg1 : i32, i32
  }
  func.func @transform_3(%arg0: i32, %arg1: i32, %arg2: i32) -> (i32, i32) {
    %c0_i32 = arith.constant 0 : i32
    return %arg0, %arg1 : i32, i32
  }
  func.func @transform_4(%arg0: i32, %arg1: i32, %arg2: i32) -> (i32, i32) {
    %c0_i32 = arith.constant 0 : i32
    return %arg0, %arg1 : i32, i32
  }
}

module attributes {stable_mosaic.version = 11 : i64} {
  func.func @_linear_kernel(%arg0: i32, %arg1: i32, %arg2: i32, %arg3: memref<16x32xf32, #tpu.memory_space<vmem>>, %arg4: memref<32x32xbf16, #tpu.memory_space<vmem>>, %arg5: memref<1x32xf32, #tpu.memory_space<vmem>>, %arg6: memref<16x32xbf16, #tpu.memory_space<vmem>>, %arg7: memref<16x32xf32, #tpu.memory_space<vmem>>) attributes {dimension_semantics = [#tpu.dimension_semantics<parallel>, #tpu.dimension_semantics<parallel>, #tpu.dimension_semantics<arbitrary>], iteration_bounds = array<i64: 1, 1, 1>, scalar_prefetch = 0 : i64, scratch_operands = 1 : i64, tpu.core_type = #tpu.core_type<tc>, window_params = [{transform_indices = @transform_0, window_bounds = array<i64: 16, 32>}, {transform_indices = @transform_1, window_bounds = array<i64: 32, 32>}, {transform_indices = @transform_2, window_bounds = array<i64: 1, 32>}, {transform_indices = @transform_3, window_bounds = array<i64: 16, 32>}]} {
    %c0_i32 = arith.constant 0 : i32
    %0 = arith.cmpi eq, %arg2, %c0_i32 : i32
    %1 = arith.extui %0 : i1 to i32
    %c0_i32_0 = arith.constant 0 : i32
    %2 = arith.cmpi ne, %1, %c0_i32_0 : i32
    scf.if %2 {
      %cst_10 = arith.constant 0.000000e+00 : f32
      %13 = vector.broadcast %cst_10 : f32 to vector<16x32xf32>
      %c0_11 = arith.constant 0 : index
      %c0_12 = arith.constant 0 : index
      %14 = vector.load %arg7[%c0_11, %c0_12] : memref<16x32xf32, #tpu.memory_space<vmem>>, vector<16x32xf32>
      tpu.vector_store %arg7[%c0_11, %c0_12], %13 {strides = array<i32>} : memref<16x32xf32, #tpu.memory_space<vmem>>, vector<16x32xf32>,
    } else {
    }
    %c0 = arith.constant 0 : index
    %c0_1 = arith.constant 0 : index
    %3 = vector.load %arg7[%c0, %c0_1] : memref<16x32xf32, #tpu.memory_space<vmem>>, vector<16x32xf32>
    %c0_2 = arith.constant 0 : index
    %c0_3 = arith.constant 0 : index
    %4 = vector.load %arg3[%c0_2, %c0_3] : memref<16x32xf32, #tpu.memory_space<vmem>>, vector<16x32xf32>
    %5 = arith.truncf %4 : vector<16x32xf32> to vector<16x32xbf16>
    %c0_4 = arith.constant 0 : index
    %c0_5 = arith.constant 0 : index
    %6 = vector.load %arg4[%c0_4, %c0_5] : memref<32x32xbf16, #tpu.memory_space<vmem>>, vector<32x32xbf16>
    %cst = arith.constant dense<0.000000e+00> : vector<16x32xf32>
    %7 = tpu.matmul %5, %6, %cst {dimension_numbers = #tpu.dot_dimension_numbers<[1], [0], [0], [1], [0, 0, 1, 1], [], []>} : vector<16x32xbf16>, vector<32x32xbf16>, vector<16x32xf32> -> vector<16x32xf32>
    %8 = arith.addf %3, %7 : vector<16x32xf32>
    %c0_6 = arith.constant 0 : index
    %c0_7 = arith.constant 0 : index
    %9 = vector.load %arg7[%c0_6, %c0_7] : memref<16x32xf32, #tpu.memory_space<vmem>>, vector<16x32xf32>
    tpu.vector_store %arg7[%c0_6, %c0_7], %8 {strides = array<i32>} : memref<16x32xf32, #tpu.memory_space<vmem>>, vector<16x32xf32>,
    %c0_i32_8 = arith.constant 0 : i32
    %10 = arith.cmpi eq, %arg2, %c0_i32_8 : i32
    %11 = arith.extui %10 : i1 to i32
    %c0_i32_9 = arith.constant 0 : i32
    %12 = arith.cmpi ne, %11, %c0_i32_9 : i32
    scf.if %12 {
      %c0_10 = arith.constant 0 : index
      %c0_11 = arith.constant 0 : index
      %13 = vector.load %arg7[%c0_10, %c0_11] : memref<16x32xf32, #tpu.memory_space<vmem>>, vector<16x32xf32>
      %c0_12 = arith.constant 0 : index
      %c0_13 = arith.constant 0 : index
      %14 = vector.load %arg5[%c0_12, %c0_13] : memref<1x32xf32, #tpu.memory_space<vmem>>, vector<1x32xf32>
      %15 = vector.broadcast %14 : vector<1x32xf32> to vector<16x32xf32>
      %16 = arith.addf %13, %15 : vector<16x32xf32>
      %17 = arith.truncf %16 : vector<16x32xf32> to vector<16x32xbf16>
      %c0_14 = arith.constant 0 : index
      %c0_15 = arith.constant 0 : index
      %18 = vector.load %arg6[%c0_14, %c0_15] : memref<16x32xbf16, #tpu.memory_space<vmem>>, vector<16x32xbf16>
      tpu.vector_store %arg6[%c0_14, %c0_15], %17 {strides = array<i32>} : memref<16x32xbf16, #tpu.memory_space<vmem>>, vector<16x32xbf16>,
    } else {
    }
    return
  }
  func.func @transform_0(%arg0: i32, %arg1: i32, %arg2: i32) -> (i32, i32) {
    %c0_i32 = arith.constant 0 : i32
    return %arg0, %arg2 : i32, i32
  }
  func.func @transform_1(%arg0: i32, %arg1: i32, %arg2: i32) -> (i32, i32) {
    %c0_i32 = arith.constant 0 : i32
    return %arg2, %arg1 : i32, i32
  }
  func.func @transform_2(%arg0: i32, %arg1: i32, %arg2: i32) -> (i32, i32) {
    %c0_i32 = arith.constant 0 : i32
    %c0_i32_0 = arith.constant 0 : i32
    return %c0_i32, %arg1 : i32, i32
  }
  func.func @transform_3(%arg0: i32, %arg1: i32, %arg2: i32) -> (i32, i32) {
    %c0_i32 = arith.constant 0 : i32
    return %arg0, %arg1 : i32, i32
  }
}

module attributes {stable_mosaic.version = 11 : i64} {
  func.func @_linear_kernel(%arg0: i32, %arg1: i32, %arg2: i32, %arg3: memref<32x32xf32, #tpu.memory_space<vmem>>, %arg4: memref<32x128xbf16, #tpu.memory_space<vmem>>, %arg5: memref<1x128xf32, #tpu.memory_space<vmem>>, %arg6: memref<32x128xbf16, #tpu.memory_space<vmem>>, %arg7: memref<32x128xf32, #tpu.memory_space<vmem>>) attributes {dimension_semantics = [#tpu.dimension_semantics<parallel>, #tpu.dimension_semantics<parallel>, #tpu.dimension_semantics<arbitrary>], iteration_bounds = array<i64: 1, 1, 1>, scalar_prefetch = 0 : i64, scratch_operands = 1 : i64, tpu.core_type = #tpu.core_type<tc>, window_params = [{transform_indices = @transform_0, window_bounds = array<i64: 32, 32>}, {transform_indices = @transform_1, window_bounds = array<i64: 32, 128>}, {transform_indices = @transform_2, window_bounds = array<i64: 1, 128>}, {transform_indices = @transform_3, window_bounds = array<i64: 32, 128>}]} {
    %c0_i32 = arith.constant 0 : i32
    %0 = arith.cmpi eq, %arg2, %c0_i32 : i32
    %1 = arith.extui %0 : i1 to i32
    %c0_i32_0 = arith.constant 0 : i32
    %2 = arith.cmpi ne, %1, %c0_i32_0 : i32
    scf.if %2 {
      %cst_10 = arith.constant 0.000000e+00 : f32
      %13 = vector.broadcast %cst_10 : f32 to vector<32x128xf32>
      %c0_11 = arith.constant 0 : index
      %c0_12 = arith.constant 0 : index
      %14 = vector.load %arg7[%c0_11, %c0_12] : memref<32x128xf32, #tpu.memory_space<vmem>>, vector<32x128xf32>
      tpu.vector_store %arg7[%c0_11, %c0_12], %13 {strides = array<i32>} : memref<32x128xf32, #tpu.memory_space<vmem>>, vector<32x128xf32>,
    } else {
    }
    %c0 = arith.constant 0 : index
    %c0_1 = arith.constant 0 : index
    %3 = vector.load %arg7[%c0, %c0_1] : memref<32x128xf32, #tpu.memory_space<vmem>>, vector<32x128xf32>
    %c0_2 = arith.constant 0 : index
    %c0_3 = arith.constant 0 : index
    %4 = vector.load %arg3[%c0_2, %c0_3] : memref<32x32xf32, #tpu.memory_space<vmem>>, vector<32x32xf32>
    %5 = arith.truncf %4 : vector<32x32xf32> to vector<32x32xbf16>
    %c0_4 = arith.constant 0 : index
    %c0_5 = arith.constant 0 : index
    %6 = vector.load %arg4[%c0_4, %c0_5] : memref<32x128xbf16, #tpu.memory_space<vmem>>, vector<32x128xbf16>
    %cst = arith.constant dense<0.000000e+00> : vector<32x128xf32>
    %7 = tpu.matmul %5, %6, %cst {dimension_numbers = #tpu.dot_dimension_numbers<[1], [0], [0], [1], [0, 0, 1, 1], [], []>} : vector<32x32xbf16>, vector<32x128xbf16>, vector<32x128xf32> -> vector<32x128xf32>
    %8 = arith.addf %3, %7 : vector<32x128xf32>
    %c0_6 = arith.constant 0 : index
    %c0_7 = arith.constant 0 : index
    %9 = vector.load %arg7[%c0_6, %c0_7] : memref<32x128xf32, #tpu.memory_space<vmem>>, vector<32x128xf32>
    tpu.vector_store %arg7[%c0_6, %c0_7], %8 {strides = array<i32>} : memref<32x128xf32, #tpu.memory_space<vmem>>, vector<32x128xf32>,
    %c0_i32_8 = arith.constant 0 : i32
    %10 = arith.cmpi eq, %arg2, %c0_i32_8 : i32
    %11 = arith.extui %10 : i1 to i32
    %c0_i32_9 = arith.constant 0 : i32
    %12 = arith.cmpi ne, %11, %c0_i32_9 : i32
    scf.if %12 {
      %c0_10 = arith.constant 0 : index
      %c0_11 = arith.constant 0 : index
      %13 = vector.load %arg7[%c0_10, %c0_11] : memref<32x128xf32, #tpu.memory_space<vmem>>, vector<32x128xf32>
      %c0_12 = arith.constant 0 : index
      %c0_13 = arith.constant 0 : index
      %14 = vector.load %arg5[%c0_12, %c0_13] : memref<1x128xf32, #tpu.memory_space<vmem>>, vector<1x128xf32>
      %15 = vector.broadcast %14 : vector<1x128xf32> to vector<32x128xf32>
      %16 = arith.addf %13, %15 : vector<32x128xf32>
      %17 = arith.truncf %16 : vector<32x128xf32> to vector<32x128xbf16>
      %c0_14 = arith.constant 0 : index
      %c0_15 = arith.constant 0 : index
      %18 = vector.load %arg6[%c0_14, %c0_15] : memref<32x128xbf16, #tpu.memory_space<vmem>>, vector<32x128xbf16>
      tpu.vector_store %arg6[%c0_14, %c0_15], %17 {strides = array<i32>} : memref<32x128xbf16, #tpu.memory_space<vmem>>, vector<32x128xbf16>,
    } else {
    }
    return
  }
  func.func @transform_0(%arg0: i32, %arg1: i32, %arg2: i32) -> (i32, i32) {
    %c0_i32 = arith.constant 0 : i32
    return %arg0, %arg2 : i32, i32
  }
  func.func @transform_1(%arg0: i32, %arg1: i32, %arg2: i32) -> (i32, i32) {
    %c0_i32 = arith.constant 0 : i32
    return %arg2, %arg1 : i32, i32
  }
  func.func @transform_2(%arg0: i32, %arg1: i32, %arg2: i32) -> (i32, i32) {
    %c0_i32 = arith.constant 0 : i32
    %c0_i32_0 = arith.constant 0 : i32
    return %c0_i32, %arg1 : i32, i32
  }
  func.func @transform_3(%arg0: i32, %arg1: i32, %arg2: i32) -> (i32, i32) {
    %c0_i32 = arith.constant 0 : i32
    return %arg0, %arg1 : i32, i32
  }
}

module attributes {stable_mosaic.version = 11 : i64} {
  func.func @_attn_kernel(%arg0: i32, %arg1: memref<4x8x8xbf16, #tpu.memory_space<vmem>>, %arg2: memref<4x16x8xbf16, #tpu.memory_space<vmem>>, %arg3: memref<4x16x8xbf16, #tpu.memory_space<vmem>>, %arg4: memref<4x8x8xbf16, #tpu.memory_space<vmem>>) attributes {dimension_semantics = [#tpu.dimension_semantics<parallel>], iteration_bounds = array<i64: 2>, scalar_prefetch = 0 : i64, scratch_operands = 0 : i64, tpu.core_type = #tpu.core_type<tc>, window_params = [{transform_indices = @transform_0, window_bounds = array<i64: 4, 8, 8>}, {transform_indices = @transform_1, window_bounds = array<i64: 4, 16, 8>}, {transform_indices = @transform_2, window_bounds = array<i64: 4, 16, 8>}, {transform_indices = @transform_3, window_bounds = array<i64: 4, 8, 8>}]} {
    %c0 = arith.constant 0 : index
    %c0_0 = arith.constant 0 : index
    %c0_1 = arith.constant 0 : index
    %0 = vector.load %arg1[%c0, %c0_0, %c0_1] : memref<4x8x8xbf16, #tpu.memory_space<vmem>>, vector<4x8x8xbf16>
    %1 = arith.extf %0 : vector<4x8x8xbf16> to vector<4x8x8xf32>
    %cst = arith.constant 0.353553385 : f32
    %2 = vector.broadcast %cst : f32 to vector<4x8x8xf32>
    %3 = arith.mulf %1, %2 : vector<4x8x8xf32>
    %4 = arith.truncf %3 : vector<4x8x8xf32> to vector<4x8x8xbf16>
    %c0_2 = arith.constant 0 : index
    %c0_3 = arith.constant 0 : index
    %c0_4 = arith.constant 0 : index
    %5 = vector.load %arg2[%c0_2, %c0_3, %c0_4] : memref<4x16x8xbf16, #tpu.memory_space<vmem>>, vector<4x16x8xbf16>
    %c0_5 = arith.constant 0 : index
    %c0_6 = arith.constant 0 : index
    %c0_7 = arith.constant 0 : index
    %6 = vector.load %arg3[%c0_5, %c0_6, %c0_7] : memref<4x16x8xbf16, #tpu.memory_space<vmem>>, vector<4x16x8xbf16>
    "tpu.trace_start"() <{level = 10 : i32, message = "gqd,gkd->gqk"}> : () -> ()
    %cst_8 = arith.constant dense<0.000000e+00> : vector<4x8x16xf32>
    %7 = tpu.matmul %4, %5, %cst_8 {dimension_numbers = #tpu.dot_dimension_numbers<[2], [2], [1], [1], [0, 0, 0, 1, 1, 1], [0], [0]>} : vector<4x8x8xbf16>, vector<4x16x8xbf16>, vector<4x8x16xf32> -> vector<4x8x16xf32>
    "tpu.trace_stop"() : () -> ()
    %cst_9 = arith.constant dense<0xFF800000> : vector<4x8xf32>
    %8 = vector.multi_reduction <maximumf>, %7, %cst_9 [2] : vector<4x8x16xf32> to vector<4x8xf32>
    %9 = vector.shape_cast %8 : vector<4x8xf32> to vector<4x8x1xf32>
    %10 = vector.broadcast %9 : vector<4x8x1xf32> to vector<4x8x16xf32>
    %11 = arith.subf %7, %10 : vector<4x8x16xf32>
    %12 = math.exp %11 : vector<4x8x16xf32>
    %cst_10 = arith.constant dense<0.000000e+00> : vector<4x8xf32>
    %13 = vector.multi_reduction <add>, %12, %cst_10 [2] : vector<4x8x16xf32> to vector<4x8xf32>
    %14 = vector.shape_cast %13 : vector<4x8xf32> to vector<4x8x1xf32>
    %15 = arith.truncf %12 : vector<4x8x16xf32> to vector<4x8x16xbf16>
    "tpu.trace_start"() <{level = 10 : i32, message = "gqk,gkd->gqd"}> : () -> ()
    %cst_11 = arith.constant dense<0.000000e+00> : vector<4x8x8xf32>
    %16 = tpu.matmul %15, %6, %cst_11 {dimension_numbers = #tpu.dot_dimension_numbers<[2], [1], [1], [2], [0, 0, 0, 1, 1, 2], [0], [0]>} : vector<4x8x16xbf16>, vector<4x16x8xbf16>, vector<4x8x8xf32> -> vector<4x8x8xf32>
    "tpu.trace_stop"() : () -> ()
    %17 = tpu.reciprocal %14 {approx = true} : vector<4x8x1xf32> -> vector<4x8x1xf32>
    %18 = vector.broadcast %17 : vector<4x8x1xf32> to vector<4x8x8xf32>
    %19 = arith.mulf %16, %18 : vector<4x8x8xf32>
    %20 = arith.truncf %19 : vector<4x8x8xf32> to vector<4x8x8xbf16>
    %c0_12 = arith.constant 0 : index
    %c0_13 = arith.constant 0 : index
    %c0_14 = arith.constant 0 : index
    %21 = vector.load %arg4[%c0_12, %c0_13, %c0_14] : memref<4x8x8xbf16, #tpu.memory_space<vmem>>, vector<4x8x8xbf16>
    tpu.vector_store %arg4[%c0_12, %c0_13, %c0_14], %20 {strides = array<i32>} : memref<4x8x8xbf16, #tpu.memory_space<vmem>>, vector<4x8x8xbf16>,
    return
  }
  func.func @transform_0(%arg0: i32) -> (i32, i32, i32) {
    %c0_i32 = arith.constant 0 : i32
    %c0_i32_0 = arith.constant 0 : i32
    %c0_i32_1 = arith.constant 0 : i32
    return %arg0, %c0_i32, %c0_i32_0 : i32, i32, i32
  }
  func.func @transform_1(%arg0: i32) -> (i32, i32, i32) {
    %c0_i32 = arith.constant 0 : i32
    %c0_i32_0 = arith.constant 0 : i32
    %c0_i32_1 = arith.constant 0 : i32
    return %arg0, %c0_i32, %c0_i32_0 : i32, i32, i32
  }
  func.func @transform_2(%arg0: i32) -> (i32, i32, i32) {
    %c0_i32 = arith.constant 0 : i32
    %c0_i32_0 = arith.constant 0 : i32
    %c0_i32_1 = arith.constant 0 : i32
    return %arg0, %c0_i32, %c0_i32_0 : i32, i32, i32
  }
  func.func @transform_3(%arg0: i32) -> (i32, i32, i32) {
    %c0_i32 = arith.constant 0 : i32
    %c0_i32_0 = arith.constant 0 : i32
    %c0_i32_1 = arith.constant 0 : i32
    return %arg0, %c0_i32, %c0_i32_0 : i32, i32, i32
  }
}

module attributes {stable_mosaic.version = 11 : i64} {
  func.func @_layernorm_kernel(%arg0: i32, %arg1: memref<16x32xf32, #tpu.memory_space<vmem>>, %arg2: memref<1x32xf32, #tpu.memory_space<vmem>>, %arg3: memref<1x32xf32, #tpu.memory_space<vmem>>, %arg4: memref<16x32xf32, #tpu.memory_space<vmem>>) attributes {dimension_semantics = [#tpu.dimension_semantics<parallel>], iteration_bounds = array<i64: 1>, scalar_prefetch = 0 : i64, scratch_operands = 0 : i64, tpu.core_type = #tpu.core_type<tc>, window_params = [{transform_indices = @transform_0, window_bounds = array<i64: 16, 32>}, {pipeline_mode = #tpu.pipeline_mode<synchronous>, transform_indices = @transform_1, window_bounds = array<i64: 1, 32>}, {pipeline_mode = #tpu.pipeline_mode<synchronous>, transform_indices = @transform_2, window_bounds = array<i64: 1, 32>}, {transform_indices = @transform_3, window_bounds = array<i64: 16, 32>}]} {
    %c0 = arith.constant 0 : index
    %c0_0 = arith.constant 0 : index
    %0 = vector.load %arg1[%c0, %c0_0] : memref<16x32xf32, #tpu.memory_space<vmem>>, vector<16x32xf32>
    %cst = arith.constant dense<0.000000e+00> : vector<16xf32>
    %1 = vector.multi_reduction <add>, %0, %cst [1] : vector<16x32xf32> to vector<16xf32>
    %2 = vector.shape_cast %1 : vector<16xf32> to vector<16x1xf32>
    %cst_1 = arith.constant 3.200000e+01 : f32
    %3 = vector.broadcast %cst_1 : f32 to vector<16x1xf32>
    %4 = arith.divf %2, %3 : vector<16x1xf32>
    %5 = vector.broadcast %4 : vector<16x1xf32> to vector<16x32xf32>
    %6 = arith.subf %0, %5 : vector<16x32xf32>
    %7 = arith.mulf %6, %6 : vector<16x32xf32>
    %cst_2 = arith.constant dense<0.000000e+00> : vector<16xf32>
    %8 = vector.multi_reduction <add>, %7, %cst_2 [1] : vector<16x32xf32> to vector<16xf32>
    %9 = vector.shape_cast %8 : vector<16xf32> to vector<16x1xf32>
    %cst_3 = arith.constant 3.200000e+01 : f32
    %10 = vector.broadcast %cst_3 : f32 to vector<16x1xf32>
    %11 = arith.divf %9, %10 : vector<16x1xf32>
    %12 = vector.broadcast %4 : vector<16x1xf32> to vector<16x32xf32>
    %13 = arith.subf %0, %12 : vector<16x32xf32>
    %cst_4 = arith.constant 9.99999974E-6 : f32
    %14 = vector.broadcast %cst_4 : f32 to vector<16x1xf32>
    %15 = arith.addf %11, %14 : vector<16x1xf32>
    %16 = math.rsqrt %15 : vector<16x1xf32>
    %17 = vector.broadcast %16 : vector<16x1xf32> to vector<16x32xf32>
    %18 = arith.mulf %13, %17 : vector<16x32xf32>
    %c0_5 = arith.constant 0 : index
    %c0_6 = arith.constant 0 : index
    %19 = vector.load %arg2[%c0_5, %c0_6] : memref<1x32xf32, #tpu.memory_space<vmem>>, vector<1x32xf32>
    %20 = vector.broadcast %19 : vector<1x32xf32> to vector<16x32xf32>
    %21 = arith.mulf %18, %20 : vector<16x32xf32>
    %c0_7 = arith.constant 0 : index
    %c0_8 = arith.constant 0 : index
    %22 = vector.load %arg3[%c0_7, %c0_8] : memref<1x32xf32, #tpu.memory_space<vmem>>, vector<1x32xf32>
    %23 = vector.broadcast %22 : vector<1x32xf32> to vector<16x32xf32>
    %24 = arith.addf %21, %23 : vector<16x32xf32>
    %c0_9 = arith.constant 0 : index
    %c0_10 = arith.constant 0 : index
    %25 = vector.load %arg4[%c0_9, %c0_10] : memref<16x32xf32, #tpu.memory_space<vmem>>, vector<16x32xf32>
    tpu.vector_store %arg4[%c0_9, %c0_10], %24 {strides = array<i32>} : memref<16x32xf32, #tpu.memory_space<vmem>>, vector<16x32xf32>,
    return
  }
  func.func @transform_0(%arg0: i32) -> (i32, i32) {
    %c0_i32 = arith.constant 0 : i32
    %c0_i32_0 = arith.constant 0 : i32
    return %arg0, %c0_i32 : i32, i32
  }
  func.func @transform_1(%arg0: i32) -> (i32, i32) {
    %c0_i32 = arith.constant 0 : i32
    %c0_i32_0 = arith.constant 0 : i32
    %c0_i32_1 = arith.constant 0 : i32
    return %c0_i32, %c0_i32_0 : i32, i32
  }
  func.func @transform_2(%arg0: i32) -> (i32, i32) {
    %c0_i32 = arith.constant 0 : i32
    %c0_i32_0 = arith.constant 0 : i32
    %c0_i32_1 = arith.constant 0 : i32
    return %c0_i32, %c0_i32_0 : i32, i32
  }
  func.func @transform_3(%arg0: i32) -> (i32, i32) {
    %c0_i32 = arith.constant 0 : i32
    %c0_i32_0 = arith.constant 0 : i32
    return %arg0, %c0_i32 : i32, i32
  }
}

</mosaic_0001>

<bundles_post_ra>
// kernel: _lambda_.21
= control target key start
LH: loop header
LB: loop body
LE: loop exit
PB: predicated region body
PF: predicated region fallthrough
CT: control target
= control target key end

     0   :  { %vm22_vm0 = vcmask 261120   ;;  %v144_v0 = vmov 0.0   ;;  %vm145_vm1 = vmmov 0   ;;  %s202_s1 = inlined_call_operand.vmem [shape: bf16[32,32], index: 1, kind: input, shape index: {}]   ;;  %s203_s0 = inlined_call_operand.vmem [shape: bf16[16,32], index: 0, kind: input, shape index: {}]   ;;  %s204_s2 = inlined_call_operand.vmem [shape: f32[1,32], index: 2, kind: input, shape index: {}]   ;;  %s205_s3 = inlined_call_operand.vmem [shape: f32[16,32], index: 3, kind: input, shape index: {}]   ;;  %s206_s4 = inlined_call_operand.vmem [shape: f32[16,32], index: 4, kind: output, shape index: {}]  }
   0x1   :  { %131 = vmatprep.subr.bf16.mxu0 %v144_v0  ;;  %v141_v1 = vld [vmem:[%s202_s1 + $0x8] sm:$0xff]   ;;  %135 = vmatprep.mubr.msk.bf16.mxu0 %vm145_vm1, %v144_v0  ;;  %23 = vst.msk [vmem:[#allocation2] sm:$0xff] %vm22_vm0, %v144_v0  ;;  %24 = vst.msk [vmem:[#allocation2 + $0x8] sm:$0xff] %vm22_vm0, %v144_v0  ;;  %v142_v2 = vld [vmem:[%s202_s1] sm:$0xff]  }
   0x2   :  { %132 = vmatpush3.bf16.msra.mxu0 %v141_v1  ;;  %v143_v3 = vld [vmem:[%s203_s0] sm:$0xff]   ;;  %v114_v18 = vld [vmem:[%s205_s3 + $0x8] sm:$0xff] }
   0x3   :  { %133 = vmatprep.subr.bf16.mxu0 %v144_v0  ;;  %v127_v12 = vld [vmem:[%s204_s2] ss:$0 sm:$0xff] }
   0x4   :  { %v113_v14 = vld [vmem:[%s205_s3] sm:$0xff] }
   0x6   :  { %134 = vmatpush3.bf16.msra.mxu0 %v142_v2 }
   0x8   :  { %v25_v4 = vld [vmem:[#allocation2] sm:$0xff]  ;;  %v26_v8 = vld [vmem:[#allocation2 + $0x8] sm:$0xff] }
   0x9   :  { %136 = vmatmul.mubr.msk.bf16.vlgmr.msra.gmra.mxu0 %vm22_vm0, %v143_v3 }
  0xc9   :  { %v88_v5 = vpop.f32.mrf.mxu0 }
  0xca   :  { %v95_v6 = vadd.f32 %v88_v5, %v25_v4 }
  0xcb   :  { %v137_v7 = vpop.f32.mrf.mxu0 }
  0xcc   :  { %97 = vst.msk [vmem:[#allocation2] sm:$0xff] %vm22_vm0, %v95_v6 }
  0xcd   :  { %v91_v9 = vpop.f32.mrf.mxu0 }
  0xce   :  { %v96_v10 = vadd.f32 %v91_v9, %v26_v8 }
  0xcf   :  { %v138_v11 = vpop.f32.mrf.mxu0 }
  0xd0   :  { %98 = vst.msk [vmem:[#allocation2 + $0x8] sm:$0xff] %vm22_vm0, %v96_v10 }
  0xd3   :  { %v102_v13 = vld [vmem:[#allocation2] sm:$0xff] }
  0xd4   :  { %v111_v15 = vadd.f32 %v127_v12, %v102_v13 }
  0xd6   :  { %v115_v16 = vadd.f32 %v113_v14, %v111_v15 }
  0xd7   :  { %v103_v17 = vld [vmem:[#allocation2 + $0x8] sm:$0xff] }
  0xd8   :  { %117 = vst.msk [vmem:[%s206_s4] sm:$0xff] %vm22_vm0, %v115_v16  ;;  %v112_v19 = vadd.f32 %v127_v12, %v103_v17 }
  0xda   :  { %v116_v20 = vadd.f32 %v114_v18, %v112_v19 }
  0xdc   :  { %118 = vst.msk [vmem:[%s206_s4 + $0x8] sm:$0xff] %vm22_vm0, %v116_v20 }

// kernel: _lambda_.19
= control target key start
LH: loop header
LB: loop body
LE: loop exit
PB: predicated region body
PF: predicated region fallthrough
CT: control target
= control target key end

     0   :  { %vm27_vm0 = vcmask 261120   ;;  %v209_v15 = vmov 0.0   ;;  %vm210_vm1 = vmmov 0   ;;  %vm81_vm2 = vcmask 257024   ;;  %s273_s0 = inlined_call_operand.vmem [shape: f32[16,32], index: 0, kind: input, shape index: {}]   ;;  %s274_s3 = inlined_call_operand.vmem [shape: bf16[32,96], index: 3, kind: input, shape index: {}]   ;;  %s275_s1 = inlined_call_operand.vmem [shape: f32[1,32], index: 1, kind: input, shape index: {}]   ;;  %s276_s2 = inlined_call_operand.vmem [shape: f32[1,32], index: 2, kind: input, shape index: {}]   ;;  %s277_s4 = inlined_call_operand.vmem [shape: f32[1,96], index: 4, kind: input, shape index: {}]   ;;  %s278_s5 = inlined_call_operand.vmem [shape: bf16[16,96], index: 5, kind: output, shape index: {}]  }
   0x1   :  { %v25_v0 = vld [vmem:[%s273_s0] sm:$0xff]  ;;  %v26_v1 = vld [vmem:[%s273_s0 + $0x8] sm:$0xff]  ;;  %192 = vmatprep.subr.bf16.mxu0 %v209_v15  ;;  %196 = vmatprep.mubr.msk.bf16.mxu0 %vm210_vm1, %v209_v15  ;;  %vm167_vm3 = vcmask 781312  }
   0x2   :  { %v28_v2 = vsel %vm27_vm0, %v25_v0, 0.0  ;;  %v31_v3 = vsel %vm27_vm0, %v26_v1, 0.0  ;;  %v202_v14 = vld [vmem:[%s274_s3 + $0x8] sm:$0xff]   ;;  %v203_v16 = vld [vmem:[%s274_s3] sm:$0xff]  }
   0x3   :  { %29 = vadd.xlane.f32.xlu0 %v28_v2  ;;  %193 = vmatpush3.bf16.msra.mxu0 %v202_v14  ;;  %v174_v24 = vld [vmem:[%s275_s1] ss:$0 sm:$0xff] }
   0x4   :  { %194 = vmatprep.subr.bf16.mxu0 %v209_v15  ;;  %v175_v26 = vld [vmem:[%s276_s2] ss:$0 sm:$0xff] }
   0x5   :  { %v178_v36 = vld [vmem:[%s277_s4] ss:$0 sm:$0xff] }
   0x7   :  { %32 = vadd.xlane.f32.xlu0 %v31_v3  ;;  %195 = vmatpush3.bf16.msra.mxu0 %v203_v16 }
  0x8c   :  { %v30_v4 = vpop.xlane.xlu0 %29 }
  0x8d   :  { %v35_v5 = vmul.f32 0.03125, %v30_v4 }
  0x8f   :  { %v37_v6 = vsub.f32 %v25_v0, %v35_v5 }
  0x90   :  { %v33_v7 = vpop.xlane.xlu0 %32 }
  0x91   :  { %v36_v8 = vmul.f32 0.03125, %v33_v7  ;;  %v39_v9 = vmul.f32 %v37_v6, %v37_v6 }
  0x93   :  { %v38_v10 = vsub.f32 %v26_v1, %v36_v8  ;;  %v41_v11 = vsel %vm27_vm0, %v39_v9, 0.0 }
  0x94   :  { %42 = vadd.xlane.f32.xlu1 %v41_v11 }
  0x95   :  { %v40_v12 = vmul.f32 %v38_v10, %v38_v10 }
  0x97   :  { %v44_v13 = vsel %vm27_vm0, %v40_v12, 0.0 }
  0x98   :  { %45 = vadd.xlane.f32.xlu1 %v44_v13 }
 0x11d   :  { %v43_v17 = vpop.xlane.xlu1 %42 }
 0x11e   :  { %v47_v18 = vmul.f32 0.03125, %v43_v17 }
 0x120   :  { %v49_v19 = vadd.f32 1e-05, %v47_v18 }
 0x121   :  { %v46_v20 = vpop.xlane.xlu1 %45 }
 0x122   :  { %205 = vrsqrt.f32 %v49_v19  ;;  %v48_v21 = vmul.f32 0.03125, %v46_v20 }
 0x124   :  { %v50_v22 = vadd.f32 1e-05, %v48_v21 }
 0x126   :  { %207 = vrsqrt.f32 %v50_v22 }
 0x12f   :  { %v206_v23 = vpop.eup %205 }
 0x130   :  { %v53_v25 = vmul.f32 %v206_v23, %v37_v6 }
 0x132   :  { %v62_v27 = vmul.f32 %v174_v24, %v53_v25 }
 0x133   :  { %v208_v28 = vpop.eup %207 }
 0x134   :  { %v71_v29 = vadd.f32 %v175_v26, %v62_v27  ;;  %v54_v30 = vmul.f32 %v208_v28, %v38_v10 }
 0x136   :  { %v185_v31 = vpack.c.bf16 %v71_v29, %v71_v29  ;;  %v63_v32 = vmul.f32 %v174_v24, %v54_v30 }
 0x138   :  { %82 = vst.msk [vmem:[#allocation2] sm:$0xf] %vm81_vm2, %v185_v31  ;;  %v72_v33 = vadd.f32 %v175_v26, %v63_v32 }
 0x13a   :  { %v186_v34 = vpack.c.bf16 %v72_v33, %v72_v33 }
 0x13c   :  { %83 = vst.msk [vmem:[#allocation2 + $0x4] sm:$0xf] %vm81_vm2, %v186_v34 }
 0x143   :  { %v204_v35 = vld [vmem:[#allocation2] sm:$0xff]  }
 0x144   :  { %197 = vmatmul.mubr.msk.bf16.vlgmr.msra.gmra.mxu0 %vm27_vm0, %v204_v35 }
 0x204   :  { %v152_v37 = vpop.f32.mrf.mxu0 }
 0x205   :  { %v153_v38 = vadd.f32 %v178_v36, %v152_v37 }
 0x206   :  { %v198_v39 = vpop.f32.mrf.mxu0 }
 0x207   :  { %v187_v40 = vpack.c.bf16 %v153_v38, %v153_v38 }
 0x208   :  { %v155_v41 = vpop.f32.mrf.mxu0 }
 0x209   :  { %168 = vst.msk [vmem:[%s278_s5] sm:$0xf] %vm167_vm3, %v187_v40  ;;  %v156_v42 = vadd.f32 %v178_v36, %v155_v41 }
 0x20a   :  { %v199_v43 = vpop.f32.mrf.mxu0 }
 0x20b   :  { %v188_v44 = vpack.c.bf16 %v156_v42, %v156_v42 }
 0x20d   :  { %169 = vst.msk [vmem:[%s278_s5 + $0x4] sm:$0xf] %vm167_vm3, %v188_v44 }

// kernel: _lambda_.20
= control target key start
LH: loop header
LB: loop body
LE: loop exit
PB: predicated region body
PF: predicated region fallthrough
CT: control target
= control target key end

     0   :  { %s902_s12 = smov 0   ;;  %s979_s0 = inlined_call_operand.vmem [shape: bf16[8,8,8], index: 0, kind: input, shape index: {}]   ;;  %s980_s1 = inlined_call_operand.vmem [shape: bf16[8,8,8], index: 1, kind: input, shape index: {}]   ;;  %s981_s2 = inlined_call_operand.vmem [shape: bf16[8,8,8], index: 2, kind: input, shape index: {}]   ;;  %s982_s3 = inlined_call_operand.vmem [shape: bf16[8,8,8], index: 3, kind: output, shape index: {}]  }
   0x1 LB: > { %s750_s13 = sadd.s32 4294967295, %s878_s12   ;;  %p754_p0 = scmp.ge.s32.totalorder %s878_s12, 1  ;;  %s878_s12 = sphi %s902_s12, %s13_s12  }
   0x2   : > { %p160_p1 = scmp.lt.s32.totalorder %s878_s12, 3 }
   0x4   : > { %p161_p2 = pnand %p754_p0, %p160_p1 }
   0x5   : > { %s755_s14 = sshll.u32 (!%p161_p2), %s750_s13, 2 }
   0x6   : > { %164 = sbr.rel (%p161_p2) target bundleno = 586 (0x24a), region = 32  ;;  %p195_p3 = scmp.lt.s32.totalorder (!%p161_p2), %s755_s14, 7 }
   0xb   : > { %v880_v0 = vmov 0.0   ;;  %vm881_vm0 = vmmov 0   ;;  %s984_s14 = smov (!%p195_p3, %s755_s14), 7  ;;  %vm243_vm1 = vcmask 64512   ;;  %vm471_vm2 = vcmask 1043456  }
   0xc   : > { %798 = vmatprep.subr.bf16.mxu0 %v880_v0  ;;  %804 = vmatprep.subr.bf16.mxu1 %v880_v0  ;;  %s916_s15 = sshll.u32 %s984_s14, 2  ;;  %vm665_vm3 = vcmask 60416  }
   0xd   : > { %800 = vmatprep.mubr.msk.bf16.mxu0 %vm881_vm0, %v880_v0  ;;  %806 = vmatprep.mubr.msk.bf16.mxu1 %vm881_vm0, %v880_v0  ;;  %s204_s18 = scalar_lea.vmem %s980_s1, %s916_s15  ;;  %s198_s21 = scalar_lea.vmem %s979_s0, %s916_s15 }
   0xe   : > { %v235_v1 = vld [vmem:[%s204_s18] sm:$0xf]  ;;  %v236_v2 = vld [vmem:[%s204_s18 + $0x4] sm:$0xf]  ;;  %v781_v8 = vld [vmem:[%s198_s21 + $0x8] sm:$0xff]   ;;  %s210_s24 = scalar_lea.vmem %s981_s2, %s916_s15  ;;  %s216_s27 = scalar_lea.vmem %s982_s3, %s916_s15 }
   0xf   : > { %v774_v3 = vld [vmem:[%s198_s21] sm:$0xff]   ;;  %v248_v4 = vsel %vm243_vm1, %v235_v1, 0  ;;  %v294_v5 = vsel %vm243_vm1, %v236_v2, 0  ;;  %v237_v11 = vld [vmem:[%s204_s18 + $0x8] sm:$0xf]  ;;  %v779_v13 = vunpack.c.l.bf16 %v781_v8  ;;  %v780_v14 = vunpack.c.h.bf16 %v781_v8 }
  0x10   : > { %v775_v6 = vunpack.c.l.bf16 %v774_v3  ;;  %v776_v7 = vunpack.c.h.bf16 %v774_v3  ;;  %799 = vmatpush3.bf16.xpose.msra.mxu0 %v248_v4  ;;  %805 = vmatpush3.bf16.xpose.msra.mxu1 %v294_v5  ;;  %v238_v12 = vld [vmem:[%s204_s18 + $0xc] sm:$0xf]  ;;  %v340_v17 = vsel %vm243_vm1, %v237_v11, 0  ;;  %v239_v43 = vld [vmem:[%s210_s24] sm:$0xf] }
  0x11   : > { %810 = vmatprep.subr.bf16.mxu0 %v880_v0  ;;  %816 = vmatprep.subr.bf16.mxu1 %v880_v0  ;;  %v386_v18 = vsel %vm243_vm1, %v238_v12, 0  ;;  %v229_v19 = vmul.f32 0.35355338, %v779_v13  ;;  %v230_v20 = vmul.f32 0.35355338, %v780_v14  ;;  %v473_v44 = vsel %vm471_vm2, %v239_v43, 0 }
  0x12   : > { %v227_v9 = vmul.f32 0.35355338, %v775_v6  ;;  %v228_v10 = vmul.f32 0.35355338, %v776_v7  ;;  %v240_v45 = vld [vmem:[%s210_s24 + $0x4] sm:$0xf] }
  0x13   : > { %v233_v21 = vpack.c.bf16 %v229_v19, %v229_v19  ;;  %v234_v22 = vpack.c.bf16 %v230_v20, %v230_v20  ;;  %v519_v46 = vsel %vm471_vm2, %v240_v45, 0  ;;  %v241_v47 = vld [vmem:[%s210_s24 + $0x8] sm:$0xf]  ;;  %v242_v49 = vld [vmem:[%s210_s24 + $0xc] sm:$0xf] }
  0x14   : > { %v231_v15 = vpack.c.bf16 %v227_v9, %v227_v9  ;;  %v232_v16 = vpack.c.bf16 %v228_v10, %v228_v10  ;;  %v565_v48 = vsel %vm471_vm2, %v241_v47, 0  ;;  %v611_v50 = vsel %vm471_vm2, %v242_v49, 0 }
  0x17   : > { %801 = vmatmul.mubr.msk.bf16.vlgmr.msra.gmra.mxu0 %vm243_vm1, %v231_v15  ;;  %807 = vmatmul.mubr.msk.bf16.vlgmr.msra.gmra.mxu1 %vm243_vm1, %v232_v16 }
  0x18   : > { %811 = vmatpush3.bf16.xpose.msra.mxu0 %v340_v17  ;;  %817 = vmatpush3.bf16.xpose.msra.mxu1 %v386_v18 }
  0x19   : > { %812 = vmatprep.mubr.msk.bf16.mxu0 %vm881_vm0, %v880_v0  ;;  %818 = vmatprep.mubr.msk.bf16.mxu1 %vm881_vm0, %v880_v0 }
  0x1a   : > { %822 = vmatprep.subr.bf16.mxu0 %v880_v0  ;;  %828 = vmatprep.subr.bf16.mxu1 %v880_v0 }
  0x1f   : > { %813 = vmatmul.mubr.msk.bf16.vlgmr.msra.gmra.mxu0 %vm243_vm1, %v233_v21  ;;  %819 = vmatmul.mubr.msk.bf16.vlgmr.msra.gmra.mxu1 %vm243_vm1, %v234_v22 }
  0x20   : > { %824 = vmatprep.mubr.msk.bf16.mxu0 %vm881_vm0, %v880_v0  ;;  %830 = vmatprep.mubr.msk.bf16.mxu1 %vm881_vm0, %v880_v0 }
  0x21   : > { %823 = vmatpush3.bf16.msra.mxu0 %v473_v44  ;;  %829 = vmatpush3.bf16.msra.mxu1 %v519_v46 }
  0x22   : > { %834 = vmatprep.subr.bf16.mxu0 %v880_v0  ;;  %840 = vmatprep.subr.bf16.mxu1 %v880_v0 }
  0xd7   : > { %v284_v23 = vpop.f32.mrf.mxu0  ;;  %v330_v24 = vpop.f32.mrf.mxu1 }
  0xd8   : > { %v428_v25 = vsel %vm243_vm1, %v284_v23, -inf  ;;  %v431_v28 = vsel %vm243_vm1, %v330_v24, -inf }
  0xd9   : > { %v808_v26 = vpop.f32.mrf.mxu1  ;;  %429 = vmax.xlane.f32.xlu0 %v428_v25  ;;  %v802_v27 = vpop.f32.mrf.mxu0 }
  0xdb   : > { %v287_v29 = vpop.f32.mrf.mxu0  ;;  %v333_v30 = vpop.f32.mrf.mxu1 }
  0xdd   : > { %v809_v31 = vpop.f32.mrf.mxu1  ;;  %432 = vmax.xlane.f32.xlu0 %v431_v28  ;;  %v803_v32 = vpop.f32.mrf.mxu0 }
  0xdf   : > { %v376_v33 = vpop.f32.mrf.mxu0  ;;  %v422_v34 = vpop.f32.mrf.mxu1 }
  0xe0   : > { %v434_v35 = vsel %vm243_vm1, %v376_v33, -inf  ;;  %v437_v38 = vsel %vm243_vm1, %v422_v34, -inf }
  0xe1   : > { %v820_v36 = vpop.f32.mrf.mxu1  ;;  %435 = vmax.xlane.f32.xlu1 %v434_v35  ;;  %v814_v37 = vpop.f32.mrf.mxu0 }
  0xe3   : > { %v379_v39 = vpop.f32.mrf.mxu0  ;;  %v425_v40 = vpop.f32.mrf.mxu1 }
  0xe5   : > { %v821_v41 = vpop.f32.mrf.mxu1  ;;  %438 = vmax.xlane.f32.xlu1 %v437_v38  ;;  %v815_v42 = vpop.f32.mrf.mxu0 }
 0x162   : > { %v430_v51 = vpop.xlane.xlu0 %429 }
 0x163   : > { %v440_v52 = vsub.f32 %v284_v23, %v430_v51 }
 0x165   : > { %v444_v53 = vmul.f32 1.442695, %v440_v52 }
 0x166   : > { %v433_v54 = vpop.xlane.xlu0 %432 }
 0x167   : > { %856 = vpow2.f32 %v444_v53  ;;  %v441_v55 = vsub.f32 %v330_v24, %v433_v54 }
 0x169   : > { %v446_v56 = vmul.f32 1.442695, %v441_v55 }
 0x16a   : > { %v436_v57 = vpop.xlane.xlu1 %435 }
 0x16b   : > { %858 = vpow2.f32 %v446_v56  ;;  %v442_v58 = vsub.f32 %v376_v33, %v436_v57 }
 0x16d   : > { %v448_v59 = vmul.f32 1.442695, %v442_v58 }
 0x16e   : > { %v439_v60 = vpop.xlane.xlu1 %438 }
 0x16f   : > { %860 = vpow2.f32 %v448_v59  ;;  %v443_v61 = vsub.f32 %v422_v34, %v439_v60 }
 0x171   : > { %v450_v62 = vmul.f32 1.442695, %v443_v61 }
 0x173   : > { %862 = vpow2.f32 %v450_v62 }
 0x174   : > { %v857_v63 = vpop.eup %856 }
 0x175   : > { %v452_v1 = vsel %vm243_vm1, %v857_v63, 0.0  ;;  %v464_v2 = vpack.c.bf16 %v857_v63, %v857_v63 }
 0x176   : > { %453 = vadd.xlane.f32.xlu0 %v452_v1 }
 0x177   : > { %825 = vmatmul.mubr.msk.bf16.vlgmr.msra.gmra.mxu0 %vm243_vm1, %v464_v2 }
 0x178   : > { %v859_v3 = vpop.eup %858  ;;  %835 = vmatpush3.bf16.msra.mxu0 %v565_v48  ;;  %836 = vmatprep.mubr.msk.bf16.mxu0 %vm881_vm0, %v880_v0 }
 0x179   : > { %v455_v4 = vsel %vm243_vm1, %v859_v3, 0.0  ;;  %v465_v5 = vpack.c.bf16 %v859_v3, %v859_v3 }
 0x17a   : > { %456 = vadd.xlane.f32.xlu1 %v455_v4 }
 0x17b   : > { %831 = vmatmul.mubr.msk.bf16.vlgmr.msra.gmra.mxu1 %vm243_vm1, %v465_v5 }
 0x17c   : > { %v861_v6 = vpop.eup %860  ;;  %841 = vmatpush3.bf16.msra.mxu1 %v611_v50  ;;  %842 = vmatprep.mubr.msk.bf16.mxu1 %vm881_vm0, %v880_v0 }
 0x17d   : > { %v458_v7 = vsel %vm243_vm1, %v861_v6, 0.0  ;;  %v466_v8 = vpack.c.bf16 %v861_v6, %v861_v6 }
 0x17e   : > { %459 = vadd.xlane.f32.xlu0 %v458_v7 }
 0x17f   : > { %837 = vmatmul.mubr.msk.bf16.vlgmr.msra.gmra.mxu0 %vm243_vm1, %v466_v8 }
 0x180   : > { %v863_v9 = vpop.eup %862 }
 0x181   : > { %v461_v10 = vsel %vm243_vm1, %v863_v9, 0.0  ;;  %v467_v11 = vpack.c.bf16 %v863_v9, %v863_v9 }
 0x182   : > { %462 = vadd.xlane.f32.xlu1 %v461_v10 }
 0x183   : > { %843 = vmatmul.mubr.msk.bf16.vlgmr.msra.gmra.mxu1 %vm243_vm1, %v467_v11 }
 0x1ff   : > { %v454_v12 = vpop.xlane.xlu0 %453 }
 0x200   : > { %864 = vrcp.f32 %v454_v12 }
 0x203   : > { %v457_v13 = vpop.xlane.xlu1 %456 }
 0x204   : > { %866 = vrcp.f32 %v457_v13 }
 0x207   : > { %v460_v14 = vpop.xlane.xlu0 %459 }
 0x208   : > { %868 = vrcp.f32 %v460_v14 }
 0x20b   : > { %v463_v0 = vpop.xlane.xlu1 %462 }
 0x20c   : > { %870 = vrcp.f32 %v463_v0 }
 0x20d   : > { %v865_v15 = vpop.eup %864 }
 0x211   : > { %v867_v20 = vpop.eup %866 }
 0x215   : > { %v869_v27 = vpop.eup %868 }
 0x219   : > { %v871_v34 = vpop.eup %870 }
 0x237   : > { %v509_v16 = vpop.f32.mrf.mxu0 }
 0x238   : > { %v657_v17 = vmul.f32 %v865_v15, %v509_v16 }
 0x239   : > { %v826_v18 = vpop.f32.mrf.mxu0 }
 0x23a   : > { %v661_v19 = vpack.c.bf16 %v657_v17, %v657_v17 }
 0x23b   : > { %v512_v21 = vpop.f32.mrf.mxu0  ;;  %v555_v22 = vpop.f32.mrf.mxu1 }
 0x23c   : > { %666 = vst.msk [vmem:[%s216_s27] sm:$0xf] %vm665_vm3, %v661_v19  ;;  %v658_v23 = vmul.f32 %v867_v20, %v555_v22 }
 0x23d   : > { %v827_v24 = vpop.f32.mrf.mxu0  ;;  %v832_v25 = vpop.f32.mrf.mxu1 }
 0x23e   : > { %v662_v26 = vpack.c.bf16 %v658_v23, %v658_v23 }
 0x23f   : > { %v558_v28 = vpop.f32.mrf.mxu1  ;;  %v601_v29 = vpop.f32.mrf.mxu0 }
 0x240   : > { %667 = vst.msk [vmem:[%s216_s27 + $0x4] sm:$0xf] %vm665_vm3, %v662_v26  ;;  %v659_v30 = vmul.f32 %v869_v27, %v601_v29 }
 0x241   : > { %v833_v31 = vpop.f32.mrf.mxu1  ;;  %v838_v32 = vpop.f32.mrf.mxu0 }
 0x242   : > { %v663_v33 = vpack.c.bf16 %v659_v30, %v659_v30 }
 0x243   : > { %v604_v35 = vpop.f32.mrf.mxu0  ;;  %v647_v36 = vpop.f32.mrf.mxu1 }
 0x244   : > { %668 = vst.msk [vmem:[%s216_s27 + $0x8] sm:$0xf] %vm665_vm3, %v663_v33  ;;  %v660_v37 = vmul.f32 %v871_v34, %v647_v36 }
 0x245   : > { %v839_v38 = vpop.f32.mrf.mxu0  ;;  %v844_v39 = vpop.f32.mrf.mxu1 }
 0x246   : > { %v664_v40 = vpack.c.bf16 %v660_v37, %v660_v37 }
 0x247   : > { %v650_v41 = vpop.f32.mrf.mxu1 }
 0x248   : > { %669 = vst.msk [vmem:[%s216_s27 + $0xc] sm:$0xf] %vm665_vm3, %v664_v40 }
 0x249   : > { %v845_v42 = vpop.f32.mrf.mxu1 }
 0x24a PF: > { %s13_s12 = sadd.s32 1, %s878_s12  }
 0x24b   : > { %p10_p4 = scmp.ge.s32.totalorder %s13_s12, 4  }
 0x24d   :  { %12 = sbr.rel (!%p10_p4) target bundleno = 1 (0x1), region = 68 }

// kernel: _lambda_.22
= control target key start
LH: loop header
LB: loop body
LE: loop exit
PB: predicated region body
PF: predicated region fallthrough
CT: control target
= control target key end

     0   :  { %vm27_vm0 = vcmask 261120   ;;  %v227_v15 = vmov 0.0   ;;  %vm228_vm1 = vmmov 0   ;;  %vm81_vm2 = vcmask 257024   ;;  %s288_s0 = inlined_call_operand.vmem [shape: f32[16,32], index: 0, kind: input, shape index: {}]   ;;  %s289_s3 = inlined_call_operand.vmem [shape: bf16[32,128], index: 3, kind: input, shape index: {}]   ;;  %s290_s1 = inlined_call_operand.vmem [shape: f32[1,32], index: 1, kind: input, shape index: {}]   ;;  %s291_s2 = inlined_call_operand.vmem [shape: f32[1,32], index: 2, kind: input, shape index: {}]   ;;  %s292_s4 = inlined_call_operand.vmem [shape: f32[1,128], index: 4, kind: input, shape index: {}]   ;;  %s293_s5 = inlined_call_operand.vmem [shape: bf16[16,128], index: 5, kind: output, shape index: {}]  }
   0x1   :  { %v25_v0 = vld [vmem:[%s288_s0] sm:$0xff]  ;;  %v26_v1 = vld [vmem:[%s288_s0 + $0x8] sm:$0xff]  ;;  %206 = vmatprep.subr.bf16.mxu0 %v227_v15  ;;  %210 = vmatprep.mubr.msk.bf16.mxu0 %vm228_vm1, %v227_v15 }
   0x2   :  { %v28_v2 = vsel %vm27_vm0, %v25_v0, 0.0  ;;  %v31_v3 = vsel %vm27_vm0, %v26_v1, 0.0  ;;  %v216_v14 = vld [vmem:[%s289_s3 + $0x8] sm:$0xff]   ;;  %v217_v16 = vld [vmem:[%s289_s3] sm:$0xff]  }
   0x3   :  { %29 = vadd.xlane.f32.xlu0 %v28_v2  ;;  %207 = vmatpush3.bf16.msra.mxu0 %v216_v14  ;;  %v183_v24 = vld [vmem:[%s290_s1] ss:$0 sm:$0xff] }
   0x4   :  { %208 = vmatprep.subr.bf16.mxu0 %v227_v15  ;;  %v184_v26 = vld [vmem:[%s291_s2] ss:$0 sm:$0xff] }
   0x5   :  { %v187_v36 = vld [vmem:[%s292_s4] ss:$0 sm:$0xff] }
   0x7   :  { %32 = vadd.xlane.f32.xlu0 %v31_v3  ;;  %209 = vmatpush3.bf16.msra.mxu0 %v217_v16 }
  0x8c   :  { %v30_v4 = vpop.xlane.xlu0 %29 }
  0x8d   :  { %v35_v5 = vmul.f32 0.03125, %v30_v4 }
  0x8f   :  { %v37_v6 = vsub.f32 %v25_v0, %v35_v5 }
  0x90   :  { %v33_v7 = vpop.xlane.xlu0 %32 }
  0x91   :  { %v36_v8 = vmul.f32 0.03125, %v33_v7  ;;  %v39_v9 = vmul.f32 %v37_v6, %v37_v6 }
  0x93   :  { %v38_v10 = vsub.f32 %v26_v1, %v36_v8  ;;  %v41_v11 = vsel %vm27_vm0, %v39_v9, 0.0 }
  0x94   :  { %42 = vadd.xlane.f32.xlu1 %v41_v11 }
  0x95   :  { %v40_v12 = vmul.f32 %v38_v10, %v38_v10 }
  0x97   :  { %v44_v13 = vsel %vm27_vm0, %v40_v12, 0.0 }
  0x98   :  { %45 = vadd.xlane.f32.xlu1 %v44_v13 }
 0x11d   :  { %v43_v17 = vpop.xlane.xlu1 %42 }
 0x11e   :  { %v47_v18 = vmul.f32 0.03125, %v43_v17 }
 0x120   :  { %v49_v19 = vadd.f32 1e-05, %v47_v18 }
 0x121   :  { %v46_v20 = vpop.xlane.xlu1 %45 }
 0x122   :  { %219 = vrsqrt.f32 %v49_v19  ;;  %v48_v21 = vmul.f32 0.03125, %v46_v20 }
 0x124   :  { %v50_v22 = vadd.f32 1e-05, %v48_v21 }
 0x126   :  { %221 = vrsqrt.f32 %v50_v22 }
 0x12f   :  { %v220_v23 = vpop.eup %219 }
 0x130   :  { %v53_v25 = vmul.f32 %v220_v23, %v37_v6 }
 0x132   :  { %v62_v27 = vmul.f32 %v183_v24, %v53_v25 }
 0x133   :  { %v222_v28 = vpop.eup %221 }
 0x134   :  { %v71_v29 = vadd.f32 %v184_v26, %v62_v27  ;;  %v54_v30 = vmul.f32 %v222_v28, %v38_v10 }
 0x136   :  { %v194_v31 = vpack.c.bf16 %v71_v29, %v71_v29  ;;  %v63_v32 = vmul.f32 %v183_v24, %v54_v30 }
 0x138   :  { %82 = vst.msk [vmem:[#allocation2] sm:$0xf] %vm81_vm2, %v194_v31  ;;  %v72_v33 = vadd.f32 %v184_v26, %v63_v32 }
 0x13a   :  { %v195_v34 = vpack.c.bf16 %v72_v33, %v72_v33 }
 0x13c   :  { %83 = vst.msk [vmem:[#allocation2 + $0x4] sm:$0xf] %vm81_vm2, %v195_v34 }
 0x143   :  { %v218_v35 = vld [vmem:[#allocation2] sm:$0xff]  }
 0x144   :  { %211 = vmatmul.mubr.msk.bf16.vlgmr.msra.gmra.mxu0 %vm27_vm0, %v218_v35 }
 0x204   :  { %v152_v37 = vpop.f32.mrf.mxu0 }
 0x205   :  { %v153_v38 = vadd.f32 %v187_v36, %v152_v37 }
 0x206   :  { %v212_v39 = vpop.f32.mrf.mxu0 }
 0x207   :  { %v161_v40 = vmul.f32 0.70710677, %v153_v38  ;;  %v159_v48 = vmul.f32 0.5, %v153_v38 }
 0x208   :  { %v155_v41 = vpop.f32.mrf.mxu0 }
 0x209   :  { %223 = verf.f32 %v161_v40  ;;  %v156_v42 = vadd.f32 %v187_v36, %v155_v41 }
 0x20a   :  { %v213_v43 = vpop.f32.mrf.mxu0 }
 0x20b   :  { %v162_v44 = vmul.f32 0.70710677, %v156_v42  ;;  %v160_v49 = vmul.f32 0.5, %v156_v42 }
 0x20d   :  { %225 = verf.f32 %v162_v44 }
 0x216   :  { %v224_v45 = vpop.eup %223 }
 0x217   :  { %v165_v46 = vadd.f32 1.0, %v224_v45 }
 0x219   :  { %v167_v51 = vmul.f32 %v165_v46, %v159_v48 }
 0x21a   :  { %v226_v47 = vpop.eup %225 }
 0x21b   :  { %v166_v50 = vadd.f32 1.0, %v226_v47 }
 0x21d   :  { %v168_v52 = vmul.f32 %v166_v50, %v160_v49 }
 0x21f   :  { %v201_v53 = vpack.c.bf16 %v168_v52, %v167_v51 }
 0x221   :  { %202 = vst [vmem:[%s293_s5] sm:$0xff] %v201_v53  }

// kernel: _lambda_.23
= control target key start
LH: loop header
LB: loop body
LE: loop exit
PB: predicated region body
PF: predicated region fallthrough
CT: control target
= control target key end

     0   :  { %vm22_vm0 = vcmask 261120   ;;  %v219_v0 = vmov 0.0   ;;  %vm220_vm1 = vmmov 0   ;;  %s294_s1 = inlined_call_operand.vmem [shape: bf16[128,32], index: 1, kind: input, shape index: {}]   ;;  %s295_s0 = inlined_call_operand.vmem [shape: bf16[16,128], index: 0, kind: input, shape index: {}]   ;;  %s296_s2 = inlined_call_operand.vmem [shape: f32[1,32], index: 2, kind: input, shape index: {}]   ;;  %s297_s3 = inlined_call_operand.vmem [shape: f32[16,32], index: 3, kind: input, shape index: {}]   ;;  %s298_s4 = inlined_call_operand.vmem [shape: f32[16,32], index: 4, kind: output, shape index: {}]  }
   0x1   :  { %188 = vmatprep.subr.bf16.mxu0 %v219_v0  ;;  %v210_v1 = vld [vmem:[%s294_s1 + $0x38] sm:$0xff]   ;;  %204 = vmatprep.mubr.msk.bf16.mxu0 %vm220_vm1, %v219_v0  ;;  %23 = vst.msk [vmem:[#allocation2] sm:$0xff] %vm22_vm0, %v219_v0  ;;  %24 = vst.msk [vmem:[#allocation2 + $0x8] sm:$0xff] %vm22_vm0, %v219_v0  ;;  %v211_v2 = vld [vmem:[%s294_s1 + $0x30] sm:$0xff]  }
   0x2   :  { %189 = vmatpush3.bf16.msra.mxu0 %v210_v1  ;;  %v212_v3 = vld [vmem:[%s294_s1 + $0x28] sm:$0xff]   ;;  %v213_v4 = vld [vmem:[%s294_s1 + $0x20] sm:$0xff]   ;;  %v214_v5 = vld [vmem:[%s294_s1 + $0x18] sm:$0xff]  }
   0x3   :  { %190 = vmatprep.subr.bf16.mxu0 %v219_v0  ;;  %v215_v6 = vld [vmem:[%s294_s1 + $0x10] sm:$0xff]   ;;  %v216_v7 = vld [vmem:[%s294_s1 + $0x8] sm:$0xff]   ;;  %v217_v8 = vld [vmem:[%s294_s1] sm:$0xff]  }
   0x4   :  { %v218_v9 = vld [vmem:[%s295_s0] sm:$0xff]   ;;  %v160_v23 = vld [vmem:[%s297_s3 + $0x8] sm:$0xff] }
   0x5   :  { %v178_v18 = vld [vmem:[%s296_s2] ss:$0 sm:$0xff] }
   0x6   :  { %191 = vmatpush3.bf16.msra.mxu0 %v211_v2  ;;  %v159_v20 = vld [vmem:[%s297_s3] sm:$0xff] }
   0x7   :  { %192 = vmatprep.subr.bf16.mxu0 %v219_v0 }
   0x8   :  { %v25_v10 = vld [vmem:[#allocation2] sm:$0xff]  ;;  %v26_v14 = vld [vmem:[#allocation2 + $0x8] sm:$0xff] }
   0xa   :  { %193 = vmatpush3.bf16.msra.mxu0 %v212_v3 }
   0xb   :  { %194 = vmatprep.subr.bf16.mxu0 %v219_v0 }
   0xe   :  { %195 = vmatpush3.bf16.msra.mxu0 %v213_v4 }
   0xf   :  { %196 = vmatprep.subr.bf16.mxu0 %v219_v0 }
  0x12   :  { %197 = vmatpush3.bf16.msra.mxu0 %v214_v5 }
  0x13   :  { %198 = vmatprep.subr.bf16.mxu0 %v219_v0 }
  0x16   :  { %199 = vmatpush3.bf16.msra.mxu0 %v215_v6 }
  0x17   :  { %200 = vmatprep.subr.bf16.mxu0 %v219_v0 }
  0x1a   :  { %201 = vmatpush3.bf16.msra.mxu0 %v216_v7 }
  0x1b   :  { %202 = vmatprep.subr.bf16.mxu0 %v219_v0 }
  0x1e   :  { %203 = vmatpush3.bf16.msra.mxu0 %v217_v8 }
  0x21   :  { %205 = vmatmul.mubr.bf16.vlgmr.msra.gmra.mxu0 %v218_v9 }
  0xe1   :  { %v133_v11 = vpop.f32.mrf.mxu0 }
  0xe2   :  { %v140_v12 = vadd.f32 %v133_v11, %v25_v10 }
  0xe3   :  { %v206_v13 = vpop.f32.mrf.mxu0 }
  0xe4   :  { %143 = vst.msk [vmem:[#allocation2] sm:$0xff] %vm22_vm0, %v140_v12 }
  0xe5   :  { %v136_v15 = vpop.f32.mrf.mxu0 }
  0xe6   :  { %v141_v16 = vadd.f32 %v136_v15, %v26_v14 }
  0xe7   :  { %v207_v17 = vpop.f32.mrf.mxu0 }
  0xe8   :  { %144 = vst.msk [vmem:[#allocation2 + $0x8] sm:$0xff] %vm22_vm0, %v141_v16 }
  0xeb   :  { %v148_v19 = vld [vmem:[#allocation2] sm:$0xff] }
  0xec   :  { %v157_v21 = vadd.f32 %v178_v18, %v148_v19 }
  0xee   :  { %v161_v22 = vadd.f32 %v159_v20, %v157_v21 }
  0xef   :  { %v149_v24 = vld [vmem:[#allocation2 + $0x8] sm:$0xff] }
  0xf0   :  { %163 = vst.msk [vmem:[%s298_s4] sm:$0xff] %vm22_vm0, %v161_v22  ;;  %v158_v25 = vadd.f32 %v178_v18, %v149_v24 }
  0xf2   :  { %v162_v26 = vadd.f32 %v160_v23, %v158_v25 }
  0xf4   :  { %164 = vst.msk [vmem:[%s298_s4 + $0x8] sm:$0xff] %vm22_vm0, %v162_v26 }

// kernel: _lambda_.24
= control target key start
LH: loop header
LB: loop body
LE: loop exit
PB: predicated region body
PF: predicated region fallthrough
CT: control target
= control target key end

     0   :  { %vm19_vm0 = vcmask 261120   ;;  %v144_v0 = vmov 0.0   ;;  %vm145_vm1 = vmmov 0   ;;  %vm114_vm2 = vcmask 257024   ;;  %s192_s1 = inlined_call_operand.vmem [shape: bf16[32,32], index: 1, kind: input, shape index: {}]   ;;  %s193_s0 = inlined_call_operand.vmem [shape: f32[16,32], index: 0, kind: input, shape index: {}]   ;;  %s194_s2 = inlined_call_operand.vmem [shape: f32[1,32], index: 2, kind: input, shape index: {}]   ;;  %s195_s3 = inlined_call_operand.vmem [shape: bf16[16,32], index: 3, kind: output, shape index: {}]  }
   0x1   :  { %132 = vmatprep.subr.bf16.mxu0 %v144_v0  ;;  %v142_v1 = vld [vmem:[%s192_s1 + $0x8] sm:$0xff]   ;;  %136 = vmatprep.mubr.msk.bf16.mxu0 %vm145_vm1, %v144_v0  ;;  %20 = vst.msk [vmem:[#allocation2] sm:$0xff] %vm19_vm0, %v144_v0  ;;  %21 = vst.msk [vmem:[#allocation2 + $0x8] sm:$0xff] %vm19_vm0, %v144_v0  ;;  %v143_v2 = vld [vmem:[%s192_s1] sm:$0xff]  }
   0x2   :  { %133 = vmatpush3.bf16.msra.mxu0 %v142_v1  ;;  %v24_v3 = vld [vmem:[%s193_s0] sm:$0xff]  ;;  %v25_v4 = vld [vmem:[%s193_s0 + $0x8] sm:$0xff] }
   0x3   :  { %134 = vmatprep.subr.bf16.mxu0 %v144_v0  ;;  %v26_v5 = vpack.c.bf16 %v25_v4, %v24_v3  ;;  %v124_v14 = vld [vmem:[%s194_s2] ss:$0 sm:$0xff] }
   0x6   :  { %135 = vmatpush3.bf16.msra.mxu0 %v143_v2 }
   0x8   :  { %v22_v6 = vld [vmem:[#allocation2] sm:$0xff]  ;;  %v23_v10 = vld [vmem:[#allocation2 + $0x8] sm:$0xff] }
   0x9   :  { %137 = vmatmul.mubr.msk.bf16.vlgmr.msra.gmra.mxu0 %vm19_vm0, %v26_v5 }
  0xc9   :  { %v81_v7 = vpop.f32.mrf.mxu0 }
  0xca   :  { %v88_v8 = vadd.f32 %v81_v7, %v22_v6 }
  0xcb   :  { %v138_v9 = vpop.f32.mrf.mxu0 }
  0xcc   :  { %90 = vst.msk [vmem:[#allocation2] sm:$0xff] %vm19_vm0, %v88_v8 }
  0xcd   :  { %v84_v11 = vpop.f32.mrf.mxu0 }
  0xce   :  { %v89_v12 = vadd.f32 %v84_v11, %v23_v10 }
  0xcf   :  { %v139_v13 = vpop.f32.mrf.mxu0 }
  0xd0   :  { %91 = vst.msk [vmem:[#allocation2 + $0x8] sm:$0xff] %vm19_vm0, %v89_v12 }
  0xd3   :  { %v95_v15 = vld [vmem:[#allocation2] sm:$0xff] }
  0xd4   :  { %v104_v16 = vadd.f32 %v124_v14, %v95_v15 }
  0xd6   :  { %v127_v17 = vpack.c.bf16 %v104_v16, %v104_v16 }
  0xd7   :  { %v96_v18 = vld [vmem:[#allocation2 + $0x8] sm:$0xff] }
  0xd8   :  { %115 = vst.msk [vmem:[%s195_s3] sm:$0xf] %vm114_vm2, %v127_v17  ;;  %v105_v19 = vadd.f32 %v124_v14, %v96_v18 }
  0xda   :  { %v128_v20 = vpack.c.bf16 %v105_v19, %v105_v19 }
  0xdc   :  { %116 = vst.msk [vmem:[%s195_s3 + $0x4] sm:$0xf] %vm114_vm2, %v128_v20 }

// kernel: _lambda_.18
= control target key start
LH: loop header
LB: loop body
LE: loop exit
PB: predicated region body
PF: predicated region fallthrough
CT: control target
= control target key end

     0   :  { %vm49_vm0 = vcmask 261120   ;;  %s240_s1 = inlined_call_operand.vmem [shape: bf16[32,128], index: 1, kind: input, shape index: {}]   ;;  %s241_s0 = inlined_call_operand.vmem [shape: f32[32,32], index: 0, kind: input, shape index: {}]   ;;  %s242_s2 = inlined_call_operand.vmem [shape: f32[1,128], index: 2, kind: input, shape index: {}]   ;;  %s243_s3 = inlined_call_operand.vmem [shape: bf16[32,128], index: 3, kind: output, shape index: {}]  }
   0x1   :  { %v191_v0 = vld [vmem:[%s240_s1 + $0x8] sm:$0xff]   ;;  %v192_v1 = vld [vmem:[%s240_s1] sm:$0xff]   ;;  %v29_v5 = vld [vmem:[%s241_s0 + $0x10] sm:$0xff] }
   0x2   :  { %183 = vmatprep.subr.bf16.mxu0 %v191_v0  ;;  %v27_v2 = vld [vmem:[%s241_s0] sm:$0xff]  ;;  %v28_v3 = vld [vmem:[%s241_s0 + $0x8] sm:$0xff]  ;;  %v30_v6 = vld [vmem:[%s241_s0 + $0x18] sm:$0xff] }
   0x3   :  { %184 = vmatpush3.bf16.msra.mxu0 %v191_v0  ;;  %v31_v4 = vpack.c.bf16 %v28_v3, %v27_v2  ;;  %v32_v7 = vpack.c.bf16 %v30_v6, %v29_v5  ;;  %v159_v9 = vld [vmem:[%s242_s2] ss:$0 sm:$0xff] }
   0x4   :  { %185 = vmatprep.subr.bf16.mxu0 %v192_v1 }
   0x5   :  { %187 = vmatprep.mubr.msk.bf16.mxu0 %vm49_vm0, %v31_v4 }
   0x7   :  { %186 = vmatpush3.bf16.msra.mxu0 %v192_v1 }
   0xa   :  { %188 = vmatmul.mubr.msk.bf16.vlgmr.msra.gmra.mxu0 %vm49_vm0, %v32_v7 }
  0xca   :  { %v189_v8 = vpop.f32.mrf.mxu0 }
  0xcb   :  { %v129_v12 = vadd.f32 %v189_v8, %v159_v9 }
  0xcc   :  { %v90_v10 = vpop.f32.mrf.mxu0 }
  0xcd   :  { %v127_v15 = vadd.f32 %v159_v9, %v90_v10 }
  0xce   :  { %v190_v11 = vpop.f32.mrf.mxu0 }
  0xcf   :  { %v130_v13 = vadd.f32 %v190_v11, %v159_v9 }
  0xd0   :  { %v93_v14 = vpop.f32.mrf.mxu0 }
  0xd1   :  { %v176_v16 = vpack.c.bf16 %v130_v13, %v129_v12  ;;  %v128_v17 = vadd.f32 %v159_v9, %v93_v14 }
  0xd3   :  { %178 = vst [vmem:[%s243_s3 + $0x8] sm:$0xff] %v176_v16   ;;  %v171_v18 = vpack.c.bf16 %v128_v17, %v127_v15 }
  0xd5   :  { %172 = vst [vmem:[%s243_s3] sm:$0xff] %v171_v18  }

// kernel: _lambda_.35
= control target key start
LH: loop header
LB: loop body
LE: loop exit
PB: predicated region body
PF: predicated region fallthrough
CT: control target
= control target key end

     0   :  { %vm17_vm0 = vcmask 261120   ;;  %s156_s0 = inlined_call_operand.vmem [shape: f32[16,32], index: 0, kind: input, shape index: {}]   ;;  %s157_s1 = inlined_call_operand.vmem [shape: f32[1,32], index: 1, kind: input, shape index: {}]   ;;  %s158_s2 = inlined_call_operand.vmem [shape: f32[1,32], index: 2, kind: input, shape index: {}]   ;;  %s159_s3 = inlined_call_operand.hbm [shape: f32[16,32], index: 3, kind: output, shape index: {}]  }
   0x1   :  { %v15_v0 = vld [vmem:[%s156_s0] sm:$0xff]  ;;  %v16_v1 = vld [vmem:[%s156_s0 + $0x8] sm:$0xff] }
   0x2   :  { %8 = vsyncpa [#allocation3], 0  ;;  %v18_v2 = vsel %vm17_vm0, %v15_v0, 0.0  ;;  %v21_v3 = vsel %vm17_vm0, %v16_v1, 0.0  ;;  %v81_v21 = vld [vmem:[%s157_s1] ss:$0 sm:$0xff] }
   0x3   :  { %19 = vadd.xlane.f32.xlu0 %v18_v2  ;;  %v82_v23 = vld [vmem:[%s158_s2] ss:$0 sm:$0xff]  ;;  %s112_s19 = smov [#allocation2]  }
   0x4   :  { %s70_s20 = sshll.u32 %s112_s19, 4  ;;  %s71_s20 = int_to_ptr.vmem [resolvable:$true] %s70_s20 }
   0x5   :  { %s90_s21 = scalar_lea.vmem %s71_s20, 256  ;;  %p95_p1 = scmp.lt.s32.totalorder %s71_s20, %s71_s20 }
   0x6   :  { %p91_p0 = scmp.ne.s32.totalorder %s71_s20, %s90_s21  ;;  %p96_p2 = scmp.lt.s32.totalorder %s90_s21, %s90_s21 }
   0x7   :  { %22 = vadd.xlane.f32.xlu0 %v21_v3 }
   0x8   :  { %p97_p3 = por %p96_p2, %p95_p1 }
   0xa   :  { %p98_p4 = pnand %p97_p3, %p91_p0 }
  0x8c   :  { %v20_v4 = vpop.xlane.xlu0 %19 }
  0x8d   :  { %v25_v5 = vmul.f32 0.03125, %v20_v4 }
  0x8f   :  { %v27_v6 = vsub.f32 %v15_v0, %v25_v5 }
  0x90   :  { %v23_v7 = vpop.xlane.xlu0 %22 }
  0x91   :  { %v26_v8 = vmul.f32 0.03125, %v23_v7  ;;  %v29_v9 = vmul.f32 %v27_v6, %v27_v6 }
  0x93   :  { %v28_v10 = vsub.f32 %v16_v1, %v26_v8  ;;  %v31_v11 = vsel %vm17_vm0, %v29_v9, 0.0 }
  0x94   :  { %32 = vadd.xlane.f32.xlu1 %v31_v11 }
  0x95   :  { %v30_v12 = vmul.f32 %v28_v10, %v28_v10 }
  0x97   :  { %v34_v13 = vsel %vm17_vm0, %v30_v12, 0.0 }
  0x98   :  { %35 = vadd.xlane.f32.xlu1 %v34_v13 }
 0x11d   :  { %v33_v14 = vpop.xlane.xlu1 %32 }
 0x11e   :  { %v37_v15 = vmul.f32 0.03125, %v33_v14 }
 0x120   :  { %v39_v16 = vadd.f32 1e-05, %v37_v15 }
 0x121   :  { %v36_v17 = vpop.xlane.xlu1 %35 }
 0x122   :  { %86 = vrsqrt.f32 %v39_v16  ;;  %v38_v18 = vmul.f32 0.03125, %v36_v17 }
 0x124   :  { %v40_v19 = vadd.f32 1e-05, %v38_v18 }
 0x126   :  { %88 = vrsqrt.f32 %v40_v19 }
 0x12f   :  { %v87_v20 = vpop.eup %86 }
 0x130   :  { %v43_v22 = vmul.f32 %v87_v20, %v27_v6 }
 0x132   :  { %v52_v24 = vmul.f32 %v81_v21, %v43_v22 }
 0x133   :  { %v89_v25 = vpop.eup %88 }
 0x134   :  { %v44_v26 = vmul.f32 %v89_v25, %v28_v10  ;;  %v61_v27 = vadd.f32 %v82_v23, %v52_v24 }
 0x136   :  { %v53_v28 = vmul.f32 %v81_v21, %v44_v26  ;;  %63 = vst.msk [vmem:[#allocation2] sm:$0xff] %vm17_vm0, %v61_v27 }
 0x138   :  { %v62_v29 = vadd.f32 %v82_v23, %v53_v28 }
 0x13a   :  { %64 = vst.msk [vmem:[#allocation2 + $0x8] sm:$0xff] %vm17_vm0, %v62_v29 }
 0x13b   :  { %101 = shalt.err (!%p98_p4)
}
 0x13c   :  { %s113_s1 = smov 128   ;;  %s114_s2 = smov 8  }
 0x13d   :  { %76 = dma.vmem_to_hbm [thread:$0]  %s71_s20, 256, %s159_s3, [#allocation3], %s113_s1, %s113_s1, %s114_s2  }
 0x13e   :  { %110 = dma.done.wait [#allocation3], 256  }
 0x13f   :  { %111 = vsyncadd [#allocation3], 4294967040 }
 0x140   :  { %80 = vsyncpa [#allocation3], 1 }

// kernel: _lambda_.25
= control target key start
LH: loop header
LB: loop body
LE: loop exit
PB: predicated region body
PF: predicated region fallthrough
CT: control target
= control target key end

     0   :  { %s968_s12 = smov 0   ;;  %s1053_s0 = inlined_call_operand.vmem [shape: bf16[8,8,8], index: 0, kind: input, shape index: {}]   ;;  %s1054_s1 = inlined_call_operand.vmem [shape: bf16[8,16,8], index: 1, kind: input, shape index: {}]   ;;  %s1055_s2 = inlined_call_operand.vmem [shape: bf16[8,16,8], index: 2, kind: input, shape index: {}]   ;;  %s1056_s3 = inlined_call_operand.vmem [shape: bf16[8,8,8], index: 3, kind: output, shape index: {}]  }
   0x1 LB: > { %s796_s13 = sadd.s32 4294967295, %s944_s12   ;;  %p800_p0 = scmp.ge.s32.totalorder %s944_s12, 1  ;;  %s944_s12 = sphi %s968_s12, %s13_s12  }
   0x2   : > { %p162_p1 = scmp.lt.s32.totalorder %s944_s12, 3 }
   0x4   : > { %p163_p2 = pnand %p800_p0, %p162_p1 }
   0x5   : > { %s801_s14 = sshll.u32 (!%p163_p2), %s796_s13, 2 }
   0x6   : > { %166 = sbr.rel (%p163_p2) target bundleno = 586 (0x24a), region = 32  ;;  %p199_p3 = scmp.lt.s32.totalorder (!%p163_p2), %s801_s14, 7 }
   0xb   : > { %v946_v0 = vmov 0.0   ;;  %vm947_vm0 = vmmov 0   ;;  %s1058_s14 = smov (!%p199_p3, %s801_s14), 7  ;;  %vm262_vm1 = vcmask 64512   ;;  %vm462_vm2 = vcmask 130048  }
   0xc   : > { %856 = vmatprep.subr.bf16.mxu0 %v946_v0  ;;  %862 = vmatprep.subr.bf16.mxu1 %v946_v0  ;;  %s829_s15 = sshll.u32 %s1058_s14, 3  ;;  %s802_s16 = sshll.u32 %s1058_s14, 2  ;;  %vm711_vm3 = vcmask 60416  }
   0xd   : > { %858 = vmatprep.mubr.msk.bf16.mxu0 %vm947_vm0, %v946_v0  ;;  %864 = vmatprep.mubr.msk.bf16.mxu1 %vm947_vm0, %v946_v0  ;;  %s209_s19 = scalar_lea.vmem %s1054_s1, %s829_s15  ;;  %s202_s22 = scalar_lea.vmem %s1053_s0, %s802_s16 }
   0xe   : > { %v914_v1 = vld [vmem:[%s209_s19] sm:$0xff]   ;;  %v915_v2 = vld [vmem:[%s209_s19 + $0x8] sm:$0xff]   ;;  %s998_s25 = scalar_lea.vmem %s1055_s2, %s829_s15  ;;  %v916_v8 = vld [vmem:[%s209_s19 + $0x10] sm:$0xff]   ;;  %s222_s28 = scalar_lea.vmem %s1056_s3, %s802_s16 }
   0xf   : > { %v267_v3 = vsel %vm262_vm1, %v914_v1, 0  ;;  %v832_v4 = vld [vmem:[%s202_s22] sm:$0xff]   ;;  %v839_v5 = vld [vmem:[%s202_s22 + $0x8] sm:$0xff]   ;;  %v318_v6 = vsel %vm262_vm1, %v915_v2, 0  ;;  %v917_v11 = vld [vmem:[%s209_s19 + $0x18] sm:$0xff]   ;;  %v369_v14 = vsel %vm262_vm1, %v916_v8, 0 }
  0x10   : > { %857 = vmatpush3.bf16.xpose.msra.mxu0 %v267_v3  ;;  %v833_v7 = vunpack.c.l.bf16 %v832_v4  ;;  %863 = vmatpush3.bf16.xpose.msra.mxu1 %v318_v6  ;;  %v834_v9 = vunpack.c.h.bf16 %v832_v4  ;;  %v837_v12 = vunpack.c.l.bf16 %v839_v5  ;;  %v838_v15 = vunpack.c.h.bf16 %v839_v5  ;;  %v918_v43 = vld [vmem:[%s998_s25] sm:$0xff]   ;;  %v919_v44 = vld [vmem:[%s998_s25 + $0x8] sm:$0xff]   ;;  %v920_v58 = vld [vmem:[%s998_s25 + $0x10] sm:$0xff]  }
  0x11   : > { %868 = vmatprep.subr.bf16.mxu0 %v946_v0  ;;  %874 = vmatprep.subr.bf16.mxu1 %v946_v0  ;;  %v420_v18 = vsel %vm262_vm1, %v917_v11, 0  ;;  %v921_v62 = vld [vmem:[%s998_s25 + $0x18] sm:$0xff]  }
  0x12   : > { %v233_v10 = vmul.f32 0.35355338, %v833_v7  ;;  %v234_v13 = vmul.f32 0.35355338, %v834_v9  ;;  %v235_v19 = vmul.f32 0.35355338, %v837_v12 }
  0x13   : > { %v236_v20 = vmul.f32 0.35355338, %v838_v15 }
  0x14   : > { %v237_v16 = vpack.c.bf16 %v233_v10, %v233_v10  ;;  %v238_v17 = vpack.c.bf16 %v234_v13, %v234_v13  ;;  %v239_v21 = vpack.c.bf16 %v235_v19, %v235_v19 }
  0x15   : > { %v240_v22 = vpack.c.bf16 %v236_v20, %v236_v20 }
  0x17   : > { %859 = vmatmul.mubr.msk.bf16.vlgmr.msra.gmra.mxu0 %vm262_vm1, %v237_v16  ;;  %865 = vmatmul.mubr.msk.bf16.vlgmr.msra.gmra.mxu1 %vm262_vm1, %v238_v17 }
  0x18   : > { %869 = vmatpush3.bf16.xpose.msra.mxu0 %v369_v14  ;;  %875 = vmatpush3.bf16.xpose.msra.mxu1 %v420_v18 }
  0x19   : > { %870 = vmatprep.mubr.msk.bf16.mxu0 %vm947_vm0, %v946_v0  ;;  %876 = vmatprep.mubr.msk.bf16.mxu1 %vm947_vm0, %v946_v0 }
  0x1a   : > { %880 = vmatprep.subr.bf16.mxu0 %v946_v0  ;;  %886 = vmatprep.subr.bf16.mxu1 %v946_v0 }
  0x1f   : > { %871 = vmatmul.mubr.msk.bf16.vlgmr.msra.gmra.mxu0 %vm262_vm1, %v239_v21  ;;  %877 = vmatmul.mubr.msk.bf16.vlgmr.msra.gmra.mxu1 %vm262_vm1, %v240_v22 }
  0x20   : > { %882 = vmatprep.mubr.msk.bf16.mxu0 %vm947_vm0, %v946_v0  ;;  %888 = vmatprep.mubr.msk.bf16.mxu1 %vm947_vm0, %v946_v0 }
  0x21   : > { %881 = vmatpush3.bf16.msra.mxu0 %v918_v43  ;;  %887 = vmatpush3.bf16.msra.mxu1 %v919_v44 }
  0x22   : > { %892 = vmatprep.subr.bf16.mxu0 %v946_v0  ;;  %898 = vmatprep.subr.bf16.mxu1 %v946_v0 }
  0xd7   : > { %v303_v23 = vpop.f32.mrf.mxu0  ;;  %v354_v24 = vpop.f32.mrf.mxu1 }
  0xd8   : > { %v463_v25 = vsel %vm462_vm2, %v303_v23, -inf  ;;  %v466_v28 = vsel %vm462_vm2, %v354_v24, -inf }
  0xd9   : > { %464 = vmax.xlane.f32.xlu0 %v463_v25  ;;  %v860_v26 = vpop.f32.mrf.mxu0  ;;  %v866_v27 = vpop.f32.mrf.mxu1 }
  0xdb   : > { %v306_v29 = vpop.f32.mrf.mxu0  ;;  %v357_v30 = vpop.f32.mrf.mxu1 }
  0xdd   : > { %467 = vmax.xlane.f32.xlu0 %v466_v28  ;;  %v861_v31 = vpop.f32.mrf.mxu0  ;;  %v867_v32 = vpop.f32.mrf.mxu1 }
  0xdf   : > { %v405_v33 = vpop.f32.mrf.mxu0  ;;  %v456_v34 = vpop.f32.mrf.mxu1 }
  0xe0   : > { %v469_v35 = vsel %vm462_vm2, %v405_v33, -inf  ;;  %v472_v38 = vsel %vm462_vm2, %v456_v34, -inf }
  0xe1   : > { %470 = vmax.xlane.f32.xlu1 %v469_v35  ;;  %v872_v36 = vpop.f32.mrf.mxu0  ;;  %v878_v37 = vpop.f32.mrf.mxu1 }
  0xe3   : > { %v408_v39 = vpop.f32.mrf.mxu0  ;;  %v459_v40 = vpop.f32.mrf.mxu1 }
  0xe5   : > { %473 = vmax.xlane.f32.xlu1 %v472_v38  ;;  %v873_v41 = vpop.f32.mrf.mxu0  ;;  %v879_v42 = vpop.f32.mrf.mxu1 }
 0x162   : > { %v465_v45 = vpop.xlane.xlu0 %464 }
 0x163   : > { %v475_v46 = vsub.f32 %v303_v23, %v465_v45 }
 0x165   : > { %v479_v47 = vmul.f32 1.442695, %v475_v46 }
 0x166   : > { %v468_v48 = vpop.xlane.xlu0 %467 }
 0x167   : > { %922 = vpow2.f32 %v479_v47  ;;  %v476_v49 = vsub.f32 %v354_v24, %v468_v48 }
 0x169   : > { %v481_v50 = vmul.f32 1.442695, %v476_v49 }
 0x16a   : > { %v471_v51 = vpop.xlane.xlu1 %470 }
 0x16b   : > { %924 = vpow2.f32 %v481_v50  ;;  %v477_v52 = vsub.f32 %v405_v33, %v471_v51 }
 0x16d   : > { %v483_v53 = vmul.f32 1.442695, %v477_v52 }
 0x16e   : > { %v474_v54 = vpop.xlane.xlu1 %473 }
 0x16f   : > { %926 = vpow2.f32 %v483_v53  ;;  %v478_v55 = vsub.f32 %v456_v34, %v474_v54 }
 0x171   : > { %v485_v56 = vmul.f32 1.442695, %v478_v55 }
 0x173   : > { %928 = vpow2.f32 %v485_v56 }
 0x174   : > { %v923_v57 = vpop.eup %922 }
 0x175   : > { %v487_v59 = vsel %vm462_vm2, %v923_v57, 0.0  ;;  %v499_v60 = vpack.c.bf16 %v923_v57, %v923_v57 }
 0x176   : > { %488 = vadd.xlane.f32.xlu0 %v487_v59 }
 0x177   : > { %883 = vmatmul.mubr.msk.bf16.vlgmr.msra.gmra.mxu0 %vm462_vm2, %v499_v60 }
 0x178   : > { %v925_v61 = vpop.eup %924  ;;  %893 = vmatpush3.bf16.msra.mxu0 %v920_v58  ;;  %894 = vmatprep.mubr.msk.bf16.mxu0 %vm947_vm0, %v946_v0 }
 0x179   : > { %v490_v63 = vsel %vm462_vm2, %v925_v61, 0.0  ;;  %v500_v1 = vpack.c.bf16 %v925_v61, %v925_v61 }
 0x17a   : > { %491 = vadd.xlane.f32.xlu1 %v490_v63 }
 0x17b   : > { %889 = vmatmul.mubr.msk.bf16.vlgmr.msra.gmra.mxu1 %vm462_vm2, %v500_v1 }
 0x17c   : > { %v927_v2 = vpop.eup %926  ;;  %899 = vmatpush3.bf16.msra.mxu1 %v921_v62  ;;  %900 = vmatprep.mubr.msk.bf16.mxu1 %vm947_vm0, %v946_v0 }
 0x17d   : > { %v493_v3 = vsel %vm462_vm2, %v927_v2, 0.0  ;;  %v501_v4 = vpack.c.bf16 %v927_v2, %v927_v2 }
 0x17e   : > { %494 = vadd.xlane.f32.xlu0 %v493_v3 }
 0x17f   : > { %895 = vmatmul.mubr.msk.bf16.vlgmr.msra.gmra.mxu0 %vm462_vm2, %v501_v4 }
 0x180   : > { %v929_v5 = vpop.eup %928 }
 0x181   : > { %v496_v6 = vsel %vm462_vm2, %v929_v5, 0.0  ;;  %v502_v7 = vpack.c.bf16 %v929_v5, %v929_v5 }
 0x182   : > { %497 = vadd.xlane.f32.xlu1 %v496_v6 }
 0x183   : > { %901 = vmatmul.mubr.msk.bf16.vlgmr.msra.gmra.mxu1 %vm462_vm2, %v502_v7 }
 0x1ff   : > { %v489_v8 = vpop.xlane.xlu0 %488 }
 0x200   : > { %930 = vrcp.f32 %v489_v8 }
 0x203   : > { %v492_v9 = vpop.xlane.xlu1 %491 }
 0x204   : > { %932 = vrcp.f32 %v492_v9 }
 0x207   : > { %v495_v10 = vpop.xlane.xlu0 %494 }
 0x208   : > { %934 = vrcp.f32 %v495_v10 }
 0x20b   : > { %v498_v0 = vpop.xlane.xlu1 %497 }
 0x20c   : > { %936 = vrcp.f32 %v498_v0 }
 0x20d   : > { %v931_v11 = vpop.eup %930 }
 0x211   : > { %v933_v16 = vpop.eup %932 }
 0x215   : > { %v935_v23 = vpop.eup %934 }
 0x219   : > { %v937_v30 = vpop.eup %936 }
 0x237   : > { %v546_v12 = vpop.f32.mrf.mxu0 }
 0x238   : > { %v703_v13 = vmul.f32 %v931_v11, %v546_v12 }
 0x239   : > { %v884_v14 = vpop.f32.mrf.mxu0 }
 0x23a   : > { %v707_v15 = vpack.c.bf16 %v703_v13, %v703_v13 }
 0x23b   : > { %v549_v17 = vpop.f32.mrf.mxu0  ;;  %v595_v18 = vpop.f32.mrf.mxu1 }
 0x23c   : > { %712 = vst.msk [vmem:[%s222_s28] sm:$0xf] %vm711_vm3, %v707_v15  ;;  %v704_v19 = vmul.f32 %v933_v16, %v595_v18 }
 0x23d   : > { %v885_v20 = vpop.f32.mrf.mxu0  ;;  %v890_v21 = vpop.f32.mrf.mxu1 }
 0x23e   : > { %v708_v22 = vpack.c.bf16 %v704_v19, %v704_v19 }
 0x23f   : > { %v598_v24 = vpop.f32.mrf.mxu1  ;;  %v644_v25 = vpop.f32.mrf.mxu0 }
 0x240   : > { %713 = vst.msk [vmem:[%s222_s28 + $0x4] sm:$0xf] %vm711_vm3, %v708_v22  ;;  %v705_v26 = vmul.f32 %v935_v23, %v644_v25 }
 0x241   : > { %v891_v27 = vpop.f32.mrf.mxu1  ;;  %v896_v28 = vpop.f32.mrf.mxu0 }
 0x242   : > { %v709_v29 = vpack.c.bf16 %v705_v26, %v705_v26 }
 0x243   : > { %v647_v31 = vpop.f32.mrf.mxu0  ;;  %v693_v32 = vpop.f32.mrf.mxu1 }
 0x244   : > { %714 = vst.msk [vmem:[%s222_s28 + $0x8] sm:$0xf] %vm711_vm3, %v709_v29  ;;  %v706_v33 = vmul.f32 %v937_v30, %v693_v32 }
 0x245   : > { %v897_v34 = vpop.f32.mrf.mxu0  ;;  %v902_v35 = vpop.f32.mrf.mxu1 }
 0x246   : > { %v710_v36 = vpack.c.bf16 %v706_v33, %v706_v33 }
 0x247   : > { %v696_v37 = vpop.f32.mrf.mxu1 }
 0x248   : > { %715 = vst.msk [vmem:[%s222_s28 + $0xc] sm:$0xf] %vm711_vm3, %v710_v36 }
 0x249   : > { %v903_v38 = vpop.f32.mrf.mxu1 }
 0x24a PF: > { %s13_s12 = sadd.s32 1, %s944_s12  }
 0x24b   : > { %p10_p4 = scmp.ge.s32.totalorder %s13_s12, 4  }
 0x24d   :  { %12 = sbr.rel (!%p10_p4) target bundleno = 1 (0x1), region = 68 }

</bundles_post_ra>
